<compile_context>
chip_gen: v6e
topology: v6e:2x2x1
jax: 0.10.0
libtpu: 0.0.40
codegen_flags: <defaults>
</compile_context>

<pallas_src>
import jax
import jax.numpy as jnp
from jax.experimental import pallas as pl
from jax.experimental.pallas import tpu as pltpu

# ---- static problem sizes (single RWKV chunk: T <= chunk_len) --------------
B, T, C = 2, 8, 32          # batch, sequence, n_embd
H, S = 4, 8                 # n_head, head_size
A = H * S                   # dim_att (== n_embd here)
FF = 64                     # dim_ffn
N = B * T
N_LAYER, LAYER_ID = 2, 0    # layer 0 -> ln0 is applied
EPS = 1e-5                  # LayerNorm / GroupNorm eps (PyTorch default)

# TODO(synk): nn.Dropout branches are not implemented; this config uses dropout=0.


def _layernorm(v, w, b):
    mu = jnp.mean(v, axis=-1, keepdims=True)
    var = jnp.mean(jnp.square(v - mu), axis=-1, keepdims=True)
    return (v - mu) * jax.lax.rsqrt(var + EPS) * w + b


# ---------------------------------------------------------------------------
# Pallas kernel: full Block forward for one chunk
# ---------------------------------------------------------------------------
def rwkv_block_kernel(
    x_ref, tm_shift_ref, wkv_ref, cm_shift_ref,
    par_ref,       # [8, C]  f32: ln0w, ln0b, ln1w, ln1b, ln2w, ln2b, att_bias, pad
    watt_ref,      # [2C, 3A]   bf16  (mix-folded [Wr|Wk|Wv] for [xln1 | xx])
    wo_ref,        # [A, C]     bf16  (GroupNorm weight folded into output proj)
    wffn_ref,      # [2C, FF+C] bf16  (mix-folded [FWk|FWr] for [xln2 | fxx])
    fwv_ref,       # [FF, C]    bf16
    wmat_ref,      # [H, T, T]  f32   per-head decay matrix
    wk_ref,        # [H, T, S]  f32   w^(T-1-t), pre-broadcast over S
    wb_ref,        # [H, T, S]  f32   w^t,       pre-broadcast over S
    ws_ref,        # [H, S, S]  f32   w^T,       pre-broadcast over SxS
    out_ref, wkv_out_ref, tm_shift_out_ref, cm_shift_out_ref,
    xg_ref,        # scratch VMEM [B*T, A] f32 (per-head GroupNorm outputs)
):
    par = par_ref[...]
    x = x_ref[...]                                            # [B,T,C] f32

    if LAYER_ID == 0:                                         # static trace-time branch
        x = _layernorm(x, par[0:1], par[1:2])                 # ln0

    # ---------------- RWKV_TimeMix (attention path) ----------------
    xln1 = _layernorm(x, par[2:3], par[3:4])                  # [B,T,C]
    xx = jnp.concatenate([tm_shift_ref[...][:, None, :], xln1[:, :T - 1, :]], axis=1)

    # Single fused projection [1]: r|k|v = [xln1 | xx] @ mix-folded weights.
    xcat = jnp.concatenate([xln1, xx], axis=-1).reshape(N, 2 * C).astype(jnp.bfloat16)
    rkv = jnp.dot(xcat, watt_ref[...], preferred_element_type=jnp.float32)  # [N,3A] f32

    for h in range(H):                                        # static unroll over heads
        r_h = rkv[:, h * S:(h + 1) * S].reshape(B, T, S)
        k_h = rkv[:, A + h * S:A + (h + 1) * S].reshape(B, T, S)
        v_h = rkv[:, 2 * A + h * S:2 * A + (h + 1) * S].reshape(B, T, S)
        s_h = wkv_ref[:, h, :, :]                             # [B,S,S]
        w_h = wmat_ref[h]                                     # [T,T]
        wk_h = wk_ref[h]                                      # [T,S]
        wb_h = wb_ref[h]                                      # [T,S]
        ws_h = ws_ref[h]                                      # [S,S]

        # rr @ kk^T, then (rr@kk*w)@vv + (rr@s)*wb     (all f32, state stays f32)
        a = jnp.einsum('bts,bus->btu', r_h, k_h,
                       preferred_element_type=jnp.float32)    # [B,T,T]
        x_h = jnp.einsum('btu,bus->bts', a * w_h, v_h,
                         preferred_element_type=jnp.float32)
        x_h = x_h + jnp.einsum('bts,bsu->btu', r_h, s_h,
                               preferred_element_type=jnp.float32) * wb_h

        # s' = ws*s + k^T diag(wk) v  -- contraction over t, no explicit transpose [3]
        wkv_out_ref[:, h, :, :] = ws_h * s_h + jnp.einsum(
            'bts,btu->bsu', k_h * wk_h, v_h, preferred_element_type=jnp.float32)

        # GroupNorm(n_head, n_embd): per-head normalization over S channels.
        # Affine (gnw/gnb) is folded into wo_ref / att_bias in the glue.
        mu = jnp.mean(x_h, axis=-1, keepdims=True)
        var = jnp.mean(jnp.square(x_h - mu), axis=-1, keepdims=True)
        xg_ref[:, h * S:(h + 1) * S] = (
            (x_h - mu) * jax.lax.rsqrt(var + EPS)).reshape(N, S)

    att = jnp.dot(xg_ref[...].astype(jnp.bfloat16), wo_ref[...],
                  preferred_element_type=jnp.float32) + par[6:7]             # [N,C]
    tm_shift_out_ref[...] = xln1[:, T - 1, :]
    x = x + att.reshape(B, T, C)

    # ---------------- RWKV_ChannelMix (ffn path) ----------------
    xln2 = _layernorm(x, par[4:5], par[5:6])
    fxx = jnp.concatenate([cm_shift_ref[...][:, None, :], xln2[:, :T - 1, :]], axis=1)

    fcat = jnp.concatenate([xln2, fxx], axis=-1).reshape(N, 2 * C).astype(jnp.bfloat16)
    kr = jnp.dot(fcat, wffn_ref[...], preferred_element_type=jnp.float32)    # [N,FF+C]
    kf = jnp.square(jnp.maximum(kr[:, :FF], 0.0))                            # square(relu)
    kv = jnp.dot(kf.astype(jnp.bfloat16), fwv_ref[...],
                 preferred_element_type=jnp.float32)                         # [N,C]
    ffn = jax.nn.sigmoid(kr[:, FF:FF + C]) * kv

    cm_shift_out_ref[...] = xln2[:, T - 1, :]
    out_ref[...] = x + ffn.reshape(B, T, C)


# ---------------------------------------------------------------------------
# Parameter glue: decay matrices + weight folding (pure functions of params)
# ---------------------------------------------------------------------------
def make_decay_mats(time_decay, time_faaaa, tt):
    w = jnp.exp(-jnp.exp(time_decay.astype(jnp.float32)))      # [H]
    u = time_faaaa.astype(jnp.float32)                         # [H]
    i_idx = jnp.arange(tt, dtype=jnp.float32)[:, None]
    j_idx = jnp.arange(tt, dtype=jnp.float32)[None, :]
    diff = jnp.maximum(i_idx - j_idx - 1.0, 0.0)               # [T,T]
    pw = w[:, None, None] ** diff[None]                        # [H,T,T]
    w_mat = jnp.where((j_idx < i_idx)[None], pw, 0.0)
    w_mat = jnp.where((j_idx == i_idx)[None], u[:, None, None], w_mat)
    t = jnp.arange(tt, dtype=jnp.float32)
    wk_col = (w[:, None] ** (tt - 1.0 - t)[None])[:, :, None]  # [H,T,1]
    wb_col = (w[:, None] ** t[None])[:, :, None]               # [H,T,1]
    ws = (w ** float(tt))[:, None, None]                       # [H,1,1]
    return w_mat, wk_col, wb_col, ws


def rwkv_block_pallas(x, tm_shift, wkv, cm_shift, p):
    f32, bf16 = jnp.float32, jnp.bfloat16

    # Decay factors, pre-broadcast so the kernel never sees a size-1 lane dim [6].
    w_mat, wk_col, wb_col, ws = make_decay_mats(p['time_decay'], p['time_faaaa'], T)
    wk_b = jnp.broadcast_to(wk_col, (H, T, S)).astype(f32)
    wb_b = jnp.broadcast_to(wb_col, (H, T, S)).astype(f32)
    ws_b = jnp.broadcast_to(ws, (H, S, S)).astype(f32)

    # Fold token-shift mixing coefficients into the projection weights [1]:
    #   (x*m + xx*(1-m)) @ W  ==  x @ (diag(m) W) + xx @ (diag(1-m) W)
    def fold(mix, w):
        return mix[:, None] * w, (1.0 - mix)[:, None] * w

    wr_x, wr_s = fold(p['tmr'], p['Wr'])
    wkx, wks = fold(p['tmk'], p['Wk'])
    wvx, wvs = fold(p['tmv'], p['Wv'])
    w_att = jnp.concatenate(
        [jnp.concatenate([wr_x, wkx, wvx], axis=1),
         jnp.concatenate([wr_s, wks, wvs], axis=1)], axis=0).astype(bf16)    # [2C,3A]

    # Fold GroupNorm affine into the output projection (bias row goes into par).
    wo_s = (p['gnw'][:, None] * p['Wo']).astype(bf16)                        # [A,C]
    att_bias = (p['gnb'] @ p['Wo']).astype(f32)                              # [C]

    fkx, fks = fold(p['ftmk'], p['FWk'])
    frx, frs = fold(p['ftmr'], p['FWr'])
    w_ffn = jnp.concatenate(
        [jnp.concatenate([fkx, frx], axis=1),
         jnp.concatenate([fks, frs], axis=1)], axis=0).astype(bf16)          # [2C,FF+C]
    fwv = p['FWv'].astype(bf16)

    # All per-channel vectors in one packed operand (single DMA) [4].
    par = jnp.stack([p['ln0w'], p['ln0b'], p['ln1w'], p['ln1b'],
                     p['ln2w'], p['ln2b'], att_bias,
                     jnp.zeros((C,), f32)], axis=0).astype(f32)              # [8,C]

    inputs = (x, tm_shift, wkv, cm_shift, par, w_att, wo_s, w_ffn, fwv,
              w_mat, wk_b, wb_b, ws_b)
    out_shape = (
        jax.ShapeDtypeStruct((B, T, C), f32),      # block output
        jax.ShapeDtypeStruct((B, H, S, S), f32),   # new wkv state      (aliases wkv)
        jax.ShapeDtypeStruct((B, C), f32),         # new time-mix shift (aliases tm_shift)
        jax.ShapeDtypeStruct((B, C), f32),         # new chan-mix shift (aliases cm_shift)
    )
    # TODO(synk): for multi-chunk sequences, add a grid (chunks 'arbitrary' carrying
    # state, batch 'parallel' for v7x megacore) instead of one pallas_call per chunk.
    return pl.pallas_call(
        rwkv_block_kernel,
        out_shape=out_shape,
        in_specs=[pl.BlockSpec(memory_space=pltpu.MemorySpace.VMEM) for _ in inputs],
        out_specs=tuple(pl.BlockSpec(memory_space=pltpu.MemorySpace.VMEM)
                        for _ in out_shape),
        scratch_shapes=[pltpu.VMEM((N, A), jnp.float32)],
        # Recurrent state updated in place: no extra HBM buffers per chunk [7].
        input_output_aliases={1: 2, 2: 1, 3: 3},
    )(*inputs)


# ---------------------------------------------------------------------------
# Pure-JAX reference (mirrors the PyTorch forward exactly), for validation
# ---------------------------------------------------------------------------
def block_ref(x, tm_shift, wkv, cm_shift, p):
    if LAYER_ID == 0:
        x = _layernorm(x, p['ln0w'], p['ln0b'])
    xln1 = _layernorm(x, p['ln1w'], p['ln1b'])
    xx = jnp.concatenate([tm_shift[:, None, :], xln1[:, :-1]], axis=1)
    xk = xln1 * p['tmk'] + xx * (1 - p['tmk'])
    xv = xln1 * p['tmv'] + xx * (1 - p['tmv'])
    xr = xln1 * p['tmr'] + xx * (1 - p['tmr'])
    r = (xr @ p['Wr']).reshape(B, T, H, S).transpose(0, 2, 1, 3)
    k = (xk @ p['Wk']).reshape(B, T, H, S).transpose(0, 2, 1, 3)
    v = (xv @ p['Wv']).reshape(B, T, H, S).transpose(0, 2, 1, 3)
    w_mat, wk_col, wb_col, ws = make_decay_mats(p['time_decay'], p['time_faaaa'], T)
    a = jnp.einsum('bhts,bhus->bhtu', r, k)
    xatt = jnp.einsum('bhtu,bhus->bhts', a * w_mat[None], v)
    xatt = xatt + jnp.einsum('bhts,bhsu->bhtu', r, wkv) * wb_col[None]
    s_new = ws[None] * wkv + jnp.einsum('bhts,bhtu->bhsu', k * wk_col[None], v)
    mu = jnp.mean(xatt, -1, keepdims=True)
    var = jnp.mean(jnp.square(xatt - mu), -1, keepdims=True)
    xg = (xatt - mu) * jax.lax.rsqrt(var + EPS)
    xg = xg * p['gnw'].reshape(1, H, 1, S) + p['gnb'].reshape(1, H, 1, S)
    xg = xg.transpose(0, 2, 1, 3).reshape(B, T, C)
    att_out = xg @ p['Wo']
    tm_shift_out = xln1[:, -1]
    x = x + att_out
    xln2 = _layernorm(x, p['ln2w'], p['ln2b'])
    fxx = jnp.concatenate([cm_shift[:, None, :], xln2[:, :-1]], axis=1)
    fxk = xln2 * p['ftmk'] + fxx * (1 - p['ftmk'])
    fxr = xln2 * p['ftmr'] + fxx * (1 - p['ftmr'])
    kf = jnp.square(jnp.maximum(fxk @ p['FWk'], 0.0))
    kv = kf @ p['FWv']
    ffn_out = jax.nn.sigmoid(fxr @ p['FWr']) * kv
    cm_shift_out = xln2[:, -1]
    return x + ffn_out, s_new, tm_shift_out, cm_shift_out


if __name__ == "__main__":
    import numpy as np

    key = jax.random.PRNGKey(0)
    ks = jax.random.split(key, 20)
    sc = 0.08

    ratio_0_to_1 = LAYER_ID / (N_LAYER - 1)
    ratio_1_to_almost0 = 1.0 - LAYER_ID / N_LAYER
    ddd = jnp.arange(C, dtype=jnp.float32) / C
    hh = jnp.arange(H, dtype=jnp.float32)

    p = dict(
        ln0w=1.0 + 0.1 * jax.random.normal(ks[0], (C,)),
        ln0b=0.1 * jax.random.normal(ks[1], (C,)),
        ln1w=1.0 + 0.1 * jax.random.normal(ks[2], (C,)),
        ln1b=0.1 * jax.random.normal(ks[3], (C,)),
        ln2w=1.0 + 0.1 * jax.random.normal(ks[4], (C,)),
        ln2b=0.1 * jax.random.normal(ks[5], (C,)),
        tmk=ddd ** ratio_1_to_almost0,
        tmv=ddd ** ratio_1_to_almost0 + 0.3 * ratio_0_to_1,
        tmr=ddd ** (0.5 * ratio_1_to_almost0),
        time_decay=-8.0 + 7.0 * (hh / (H - 1)) ** (0.7 + 1.3 * ratio_0_to_1),
        time_faaaa=jnp.full((H,), 0.05, dtype=jnp.float32),
        Wr=sc * jax.random.normal(ks[6], (C, A)),
        Wk=sc * jax.random.normal(ks[7], (C, A)),
        Wv=sc * jax.random.normal(ks[8], (C, A)),
        Wo=sc * jax.random.normal(ks[9], (A, C)),
        gnw=1.0 + 0.1 * jax.random.normal(ks[10], (C,)),
        gnb=0.1 * jax.random.normal(ks[11], (C,)),
        ftmk=ddd ** ratio_1_to_almost0,
        ftmr=ddd ** ratio_1_to_almost0,
        FWk=sc * jax.random.normal(ks[12], (C, FF)),
        FWr=sc * jax.random.normal(ks[13], (C, C)),
        FWv=sc * jax.random.normal(ks[14], (FF, C)),
    )
    p = {kk: vv.astype(jnp.float32) for kk, vv in p.items()}

    x = jax.random.normal(ks[15], (B, T, C), dtype=jnp.float32)
    tm_shift = 0.5 * jax.random.normal(ks[16], (B, C), dtype=jnp.float32)
    wkv0 = 0.1 * jax.random.normal(ks[17], (B, H, S, S), dtype=jnp.float32)
    cm_shift = 0.5 * jax.random.normal(ks[18], (B, C), dtype=jnp.float32)

    # Reference first: the kernel donates (aliases) the state buffers.
    refs = block_ref(x, tm_shift, wkv0, cm_shift, p)
    refs = jax.block_until_ready(refs)

    outs = rwkv_block_pallas(x, tm_shift, wkv0, cm_shift, p)
    outs = jax.block_until_ready(outs)

    # bf16 MXU weights vs. pure-f32 reference -> slightly relaxed tolerance.
    for o, r in zip(outs, refs):
        np.testing.assert_allclose(np.asarray(o), np.asarray(r), rtol=5e-2, atol=5e-2)

    print("KERNEL_OK")
</pallas_src>

<mosaic_0001>
module attributes {stable_mosaic.version = 11 : i64} {
  func.func @rwkv_block_kernel(%arg0: memref<2x8x32xf32, #tpu.memory_space<vmem>>, %arg1: memref<2x32xf32, #tpu.memory_space<vmem>>, %arg2: memref<2x4x8x8xf32, #tpu.memory_space<vmem>>, %arg3: memref<2x32xf32, #tpu.memory_space<vmem>>, %arg4: memref<8x32xf32, #tpu.memory_space<vmem>>, %arg5: memref<64x96xbf16, #tpu.memory_space<vmem>>, %arg6: memref<32x32xbf16, #tpu.memory_space<vmem>>, %arg7: memref<64x96xbf16, #tpu.memory_space<vmem>>, %arg8: memref<64x32xbf16, #tpu.memory_space<vmem>>, %arg9: memref<4x8x8xf32, #tpu.memory_space<vmem>>, %arg10: memref<4x8x8xf32, #tpu.memory_space<vmem>>, %arg11: memref<4x8x8xf32, #tpu.memory_space<vmem>>, %arg12: memref<4x8x8xf32, #tpu.memory_space<vmem>>, %arg13: memref<2x8x32xf32, #tpu.memory_space<vmem>>, %arg14: memref<2x4x8x8xf32, #tpu.memory_space<vmem>>, %arg15: memref<2x32xf32, #tpu.memory_space<vmem>>, %arg16: memref<2x32xf32, #tpu.memory_space<vmem>>, %arg17: memref<16x32xf32, #tpu.memory_space<vmem>>) attributes {dimension_semantics = [], scalar_prefetch = 0 : i64, scratch_operands = 1 : i64, tpu.core_type = #tpu.core_type<tc>} {
    %c0 = arith.constant 0 : index
    %c0_0 = arith.constant 0 : index
    %0 = vector.load %arg4[%c0, %c0_0] : memref<8x32xf32, #tpu.memory_space<vmem>>, vector<8x32xf32>
    %c0_1 = arith.constant 0 : index
    %c0_2 = arith.constant 0 : index
    %c0_3 = arith.constant 0 : index
    %1 = vector.load %arg0[%c0_1, %c0_2, %c0_3] : memref<2x8x32xf32, #tpu.memory_space<vmem>>, vector<2x8x32xf32>
    %2 = vector.extract_strided_slice %0 {offsets = [0, 0], sizes = [1, 32], strides = [1, 1]} : vector<8x32xf32> to vector<1x32xf32>
    %3 = vector.extract_strided_slice %0 {offsets = [1, 0], sizes = [1, 32], strides = [1, 1]} : vector<8x32xf32> to vector<1x32xf32>
    %cst = arith.constant dense<0.000000e+00> : vector<2x8xf32>
    %4 = vector.multi_reduction <add>, %1, %cst [2] : vector<2x8x32xf32> to vector<2x8xf32>
    %5 = vector.shape_cast %4 : vector<2x8xf32> to vector<2x8x1xf32>
    %cst_4 = arith.constant 3.200000e+01 : f32
    %6 = vector.broadcast %cst_4 : f32 to vector<2x8x1xf32>
    %7 = arith.divf %5, %6 : vector<2x8x1xf32>
    %8 = vector.broadcast %7 : vector<2x8x1xf32> to vector<2x8x32xf32>
    %9 = arith.subf %1, %8 : vector<2x8x32xf32>
    %10 = arith.mulf %9, %9 : vector<2x8x32xf32>
    %cst_5 = arith.constant dense<0.000000e+00> : vector<2x8xf32>
    %11 = vector.multi_reduction <add>, %10, %cst_5 [2] : vector<2x8x32xf32> to vector<2x8xf32>
    %12 = vector.shape_cast %11 : vector<2x8xf32> to vector<2x8x1xf32>
    %cst_6 = arith.constant 3.200000e+01 : f32
    %13 = vector.broadcast %cst_6 : f32 to vector<2x8x1xf32>
    %14 = arith.divf %12, %13 : vector<2x8x1xf32>
    %15 = vector.broadcast %7 : vector<2x8x1xf32> to vector<2x8x32xf32>
    %16 = arith.subf %1, %15 : vector<2x8x32xf32>
    %cst_7 = arith.constant 9.99999974E-6 : f32
    %17 = vector.broadcast %cst_7 : f32 to vector<2x8x1xf32>
    %18 = arith.addf %14, %17 : vector<2x8x1xf32>
    %19 = math.rsqrt %18 : vector<2x8x1xf32>
    %20 = vector.broadcast %19 : vector<2x8x1xf32> to vector<2x8x32xf32>
    %21 = arith.mulf %16, %20 : vector<2x8x32xf32>
    %22 = vector.shape_cast %2 : vector<1x32xf32> to vector<1x1x32xf32>
    %23 = vector.broadcast %22 : vector<1x1x32xf32> to vector<2x8x32xf32>
    %24 = arith.mulf %21, %23 : vector<2x8x32xf32>
    %25 = vector.shape_cast %3 : vector<1x32xf32> to vector<1x1x32xf32>
    %26 = vector.broadcast %25 : vector<1x1x32xf32> to vector<2x8x32xf32>
    %27 = arith.addf %24, %26 : vector<2x8x32xf32>
    %28 = vector.extract_strided_slice %0 {offsets = [2, 0], sizes = [1, 32], strides = [1, 1]} : vector<8x32xf32> to vector<1x32xf32>
    %29 = vector.extract_strided_slice %0 {offsets = [3, 0], sizes = [1, 32], strides = [1, 1]} : vector<8x32xf32> to vector<1x32xf32>
    %cst_8 = arith.constant dense<0.000000e+00> : vector<2x8xf32>
    %30 = vector.multi_reduction <add>, %27, %cst_8 [2] : vector<2x8x32xf32> to vector<2x8xf32>
    %31 = vector.shape_cast %30 : vector<2x8xf32> to vector<2x8x1xf32>
    %cst_9 = arith.constant 3.200000e+01 : f32
    %32 = vector.broadcast %cst_9 : f32 to vector<2x8x1xf32>
    %33 = arith.divf %31, %32 : vector<2x8x1xf32>
    %34 = vector.broadcast %33 : vector<2x8x1xf32> to vector<2x8x32xf32>
    %35 = arith.subf %27, %34 : vector<2x8x32xf32>
    %36 = arith.mulf %35, %35 : vector<2x8x32xf32>
    %cst_10 = arith.constant dense<0.000000e+00> : vector<2x8xf32>
    %37 = vector.multi_reduction <add>, %36, %cst_10 [2] : vector<2x8x32xf32> to vector<2x8xf32>
    %38 = vector.shape_cast %37 : vector<2x8xf32> to vector<2x8x1xf32>
    %cst_11 = arith.constant 3.200000e+01 : f32
    %39 = vector.broadcast %cst_11 : f32 to vector<2x8x1xf32>
    %40 = arith.divf %38, %39 : vector<2x8x1xf32>
    %41 = vector.broadcast %33 : vector<2x8x1xf32> to vector<2x8x32xf32>
    %42 = arith.subf %27, %41 : vector<2x8x32xf32>
    %cst_12 = arith.constant 9.99999974E-6 : f32
    %43 = vector.broadcast %cst_12 : f32 to vector<2x8x1xf32>
    %44 = arith.addf %40, %43 : vector<2x8x1xf32>
    %45 = math.rsqrt %44 : vector<2x8x1xf32>
    %46 = vector.broadcast %45 : vector<2x8x1xf32> to vector<2x8x32xf32>
    %47 = arith.mulf %42, %46 : vector<2x8x32xf32>
    %48 = vector.shape_cast %28 : vector<1x32xf32> to vector<1x1x32xf32>
    %49 = vector.broadcast %48 : vector<1x1x32xf32> to vector<2x8x32xf32>
    %50 = arith.mulf %47, %49 : vector<2x8x32xf32>
    %51 = vector.shape_cast %29 : vector<1x32xf32> to vector<1x1x32xf32>
    %52 = vector.broadcast %51 : vector<1x1x32xf32> to vector<2x8x32xf32>
    %53 = arith.addf %50, %52 : vector<2x8x32xf32>
    %c0_13 = arith.constant 0 : index
    %c0_14 = arith.constant 0 : index
    %54 = vector.load %arg1[%c0_13, %c0_14] : memref<2x32xf32, #tpu.memory_space<vmem>>, vector<2x32xf32>
    %55 = vector.shape_cast %54 : vector<2x32xf32> to vector<2x1x32xf32>
    %56 = vector.extract_strided_slice %53 {offsets = [0, 0, 0], sizes = [2, 7, 32], strides = [1, 1, 1]} : vector<2x8x32xf32> to vector<2x7x32xf32>
    %57 = tpu.concatenate %55, %56 in 1 : vector<2x1x32xf32>, vector<2x7x32xf32> -> vector<2x8x32xf32>
    %58 = tpu.concatenate %53, %57 in 2 : vector<2x8x32xf32>, vector<2x8x32xf32> -> vector<2x8x64xf32>
    %59 = vector.shape_cast %58 : vector<2x8x64xf32> to vector<16x64xf32>
    %60 = arith.truncf %59 : vector<16x64xf32> to vector<16x64xbf16>
    %c0_15 = arith.constant 0 : index
    %c0_16 = arith.constant 0 : index
    %61 = vector.load %arg5[%c0_15, %c0_16] : memref<64x96xbf16, #tpu.memory_space<vmem>>, vector<64x96xbf16>
    %cst_17 = arith.constant dense<0.000000e+00> : vector<16x96xf32>
    %62 = tpu.matmul %60, %61, %cst_17 {dimension_numbers = #tpu.dot_dimension_numbers<[1], [0], [0], [1], [0, 0, 1, 1], [], []>} : vector<16x64xbf16>, vector<64x96xbf16>, vector<16x96xf32> -> vector<16x96xf32>
    %63 = vector.extract_strided_slice %62 {offsets = [0, 0], sizes = [16, 8], strides = [1, 1]} : vector<16x96xf32> to vector<16x8xf32>
    %64 = vector.shape_cast %63 : vector<16x8xf32> to vector<2x8x8xf32>
    %65 = vector.extract_strided_slice %62 {offsets = [0, 32], sizes = [16, 8], strides = [1, 1]} : vector<16x96xf32> to vector<16x8xf32>
    %66 = vector.shape_cast %65 : vector<16x8xf32> to vector<2x8x8xf32>
    %67 = vector.extract_strided_slice %62 {offsets = [0, 64], sizes = [16, 8], strides = [1, 1]} : vector<16x96xf32> to vector<16x8xf32>
    %68 = vector.shape_cast %67 : vector<16x8xf32> to vector<2x8x8xf32>
    %c0_18 = arith.constant 0 : index
    %c0_19 = arith.constant 0 : index
    %c0_20 = arith.constant 0 : index
    %c0_21 = arith.constant 0 : index
    %69 = vector.load %arg2[%c0_18, %c0_19, %c0_20, %c0_21] : memref<2x4x8x8xf32, #tpu.memory_space<vmem>>, vector<2x1x8x8xf32>
    %70 = vector.shape_cast %69 : vector<2x1x8x8xf32> to vector<2x8x8xf32>
    %c0_22 = arith.constant 0 : index
    %c0_23 = arith.constant 0 : index
    %c0_24 = arith.constant 0 : index
    %71 = vector.load %arg9[%c0_22, %c0_23, %c0_24] : memref<4x8x8xf32, #tpu.memory_space<vmem>>, vector<1x8x8xf32>
    %72 = vector.shape_cast %71 : vector<1x8x8xf32> to vector<8x8xf32>
    %c0_25 = arith.constant 0 : index
    %c0_26 = arith.constant 0 : index
    %c0_27 = arith.constant 0 : index
    %73 = vector.load %arg10[%c0_25, %c0_26, %c0_27] : memref<4x8x8xf32, #tpu.memory_space<vmem>>, vector<1x8x8xf32>
    %74 = vector.shape_cast %73 : vector<1x8x8xf32> to vector<8x8xf32>
    %c0_28 = arith.constant 0 : index
    %c0_29 = arith.constant 0 : index
    %c0_30 = arith.constant 0 : index
    %75 = vector.load %arg11[%c0_28, %c0_29, %c0_30] : memref<4x8x8xf32, #tpu.memory_space<vmem>>, vector<1x8x8xf32>
    %76 = vector.shape_cast %75 : vector<1x8x8xf32> to vector<8x8xf32>
    %c0_31 = arith.constant 0 : index
    %c0_32 = arith.constant 0 : index
    %c0_33 = arith.constant 0 : index
    %77 = vector.load %arg12[%c0_31, %c0_32, %c0_33] : memref<4x8x8xf32, #tpu.memory_space<vmem>>, vector<1x8x8xf32>
    %78 = vector.shape_cast %77 : vector<1x8x8xf32> to vector<8x8xf32>
    "tpu.trace_start"() <{level = 10 : i32, message = "bts,bus->btu"}> : () -> ()
    %cst_34 = arith.constant dense<0.000000e+00> : vector<2x8x8xf32>
    %79 = tpu.matmul %64, %66, %cst_34 {dimension_numbers = #tpu.dot_dimension_numbers<[2], [2], [1], [1], [0, 0, 0, 1, 1, 1], [0], [0]>} : vector<2x8x8xf32>, vector<2x8x8xf32>, vector<2x8x8xf32> -> vector<2x8x8xf32>
    "tpu.trace_stop"() : () -> ()
    %80 = vector.shape_cast %72 : vector<8x8xf32> to vector<1x8x8xf32>
    %81 = vector.broadcast %80 : vector<1x8x8xf32> to vector<2x8x8xf32>
    %82 = arith.mulf %79, %81 : vector<2x8x8xf32>
    "tpu.trace_start"() <{level = 10 : i32, message = "btu,bus->bts"}> : () -> ()
    %cst_35 = arith.constant dense<0.000000e+00> : vector<2x8x8xf32>
    %83 = tpu.matmul %82, %68, %cst_35 {dimension_numbers = #tpu.dot_dimension_numbers<[2], [1], [1], [2], [0, 0, 0, 1, 1, 2], [0], [0]>} : vector<2x8x8xf32>, vector<2x8x8xf32>, vector<2x8x8xf32> -> vector<2x8x8xf32>
    "tpu.trace_stop"() : () -> ()
    "tpu.trace_start"() <{level = 10 : i32, message = "bts,bsu->btu"}> : () -> ()
    %cst_36 = arith.constant dense<0.000000e+00> : vector<2x8x8xf32>
    %84 = tpu.matmul %64, %70, %cst_36 {dimension_numbers = #tpu.dot_dimension_numbers<[2], [1], [1], [2], [0, 0, 0, 1, 1, 2], [0], [0]>} : vector<2x8x8xf32>, vector<2x8x8xf32>, vector<2x8x8xf32> -> vector<2x8x8xf32>
    "tpu.trace_stop"() : () -> ()
    %85 = vector.shape_cast %76 : vector<8x8xf32> to vector<1x8x8xf32>
    %86 = vector.broadcast %85 : vector<1x8x8xf32> to vector<2x8x8xf32>
    %87 = arith.mulf %84, %86 : vector<2x8x8xf32>
    %88 = arith.addf %83, %87 : vector<2x8x8xf32>
    %89 = vector.shape_cast %78 : vector<8x8xf32> to vector<1x8x8xf32>
    %90 = vector.broadcast %89 : vector<1x8x8xf32> to vector<2x8x8xf32>
    %91 = arith.mulf %90, %70 : vector<2x8x8xf32>
    %92 = vector.shape_cast %74 : vector<8x8xf32> to vector<1x8x8xf32>
    %93 = vector.broadcast %92 : vector<1x8x8xf32> to vector<2x8x8xf32>
    %94 = arith.mulf %66, %93 : vector<2x8x8xf32>
    "tpu.trace_start"() <{level = 10 : i32, message = "bts,btu->bsu"}> : () -> ()
    %cst_37 = arith.constant dense<0.000000e+00> : vector<2x8x8xf32>
    %95 = tpu.matmul %94, %68, %cst_37 {dimension_numbers = #tpu.dot_dimension_numbers<[1], [1], [2], [2], [0, 0, 0, 2, 1, 2], [0], [0]>} : vector<2x8x8xf32>, vector<2x8x8xf32>, vector<2x8x8xf32> -> vector<2x8x8xf32>
    "tpu.trace_stop"() : () -> ()
    %96 = arith.addf %91, %95 : vector<2x8x8xf32>
    %c0_38 = arith.constant 0 : index
    %c0_39 = arith.constant 0 : index
    %c0_40 = arith.constant 0 : index
    %c0_41 = arith.constant 0 : index
    %97 = vector.load %arg14[%c0_38, %c0_39, %c0_40, %c0_41] : memref<2x4x8x8xf32, #tpu.memory_space<vmem>>, vector<2x1x8x8xf32>
    %98 = vector.shape_cast %97 : vector<2x1x8x8xf32> to vector<2x8x8xf32>
    %99 = vector.shape_cast %96 : vector<2x8x8xf32> to vector<2x1x8x8xf32>
    tpu.vector_store %arg14[%c0_38, %c0_39, %c0_40, %c0_41], %99 {strides = array<i32>} : memref<2x4x8x8xf32, #tpu.memory_space<vmem>>, vector<2x1x8x8xf32>,
    %cst_42 = arith.constant dense<0.000000e+00> : vector<2x8xf32>
    %100 = vector.multi_reduction <add>, %88, %cst_42 [2] : vector<2x8x8xf32> to vector<2x8xf32>
    %101 = vector.shape_cast %100 : vector<2x8xf32> to vector<2x8x1xf32>
    %cst_43 = arith.constant 8.000000e+00 : f32
    %102 = vector.broadcast %cst_43 : f32 to vector<2x8x1xf32>
    %103 = arith.divf %101, %102 : vector<2x8x1xf32>
    %104 = vector.broadcast %103 : vector<2x8x1xf32> to vector<2x8x8xf32>
    %105 = arith.subf %88, %104 : vector<2x8x8xf32>
    %106 = arith.mulf %105, %105 : vector<2x8x8xf32>
    %cst_44 = arith.constant dense<0.000000e+00> : vector<2x8xf32>
    %107 = vector.multi_reduction <add>, %106, %cst_44 [2] : vector<2x8x8xf32> to vector<2x8xf32>
    %108 = vector.shape_cast %107 : vector<2x8xf32> to vector<2x8x1xf32>
    %cst_45 = arith.constant 8.000000e+00 : f32
    %109 = vector.broadcast %cst_45 : f32 to vector<2x8x1xf32>
    %110 = arith.divf %108, %109 : vector<2x8x1xf32>
    %111 = vector.broadcast %103 : vector<2x8x1xf32> to vector<2x8x8xf32>
    %112 = arith.subf %88, %111 : vector<2x8x8xf32>
    %cst_46 = arith.constant 9.99999974E-6 : f32
    %113 = vector.broadcast %cst_46 : f32 to vector<2x8x1xf32>
    %114 = arith.addf %110, %113 : vector<2x8x1xf32>
    %115 = math.rsqrt %114 : vector<2x8x1xf32>
    %116 = vector.broadcast %115 : vector<2x8x1xf32> to vector<2x8x8xf32>
    %117 = arith.mulf %112, %116 : vector<2x8x8xf32>
    %118 = vector.shape_cast %117 : vector<2x8x8xf32> to vector<16x8xf32>
    %c0_47 = arith.constant 0 : index
    %c0_48 = arith.constant 0 : index
    %119 = vector.load %arg17[%c0_47, %c0_48] : memref<16x32xf32, #tpu.memory_space<vmem>>, vector<16x8xf32>
    tpu.vector_store %arg17[%c0_47, %c0_48], %118 {strides = array<i32>} : memref<16x32xf32, #tpu.memory_space<vmem>>, vector<16x8xf32>,
    %120 = vector.extract_strided_slice %62 {offsets = [0, 8], sizes = [16, 8], strides = [1, 1]} : vector<16x96xf32> to vector<16x8xf32>
    %121 = vector.shape_cast %120 : vector<16x8xf32> to vector<2x8x8xf32>
    %122 = vector.extract_strided_slice %62 {offsets = [0, 40], sizes = [16, 8], strides = [1, 1]} : vector<16x96xf32> to vector<16x8xf32>
    %123 = vector.shape_cast %122 : vector<16x8xf32> to vector<2x8x8xf32>
    %124 = vector.extract_strided_slice %62 {offsets = [0, 72], sizes = [16, 8], strides = [1, 1]} : vector<16x96xf32> to vector<16x8xf32>
    %125 = vector.shape_cast %124 : vector<16x8xf32> to vector<2x8x8xf32>
    %c0_49 = arith.constant 0 : index
    %c1 = arith.constant 1 : index
    %c0_50 = arith.constant 0 : index
    %c0_51 = arith.constant 0 : index
    %126 = vector.load %arg2[%c0_49, %c1, %c0_50, %c0_51] : memref<2x4x8x8xf32, #tpu.memory_space<vmem>>, vector<2x1x8x8xf32>
    %127 = vector.shape_cast %126 : vector<2x1x8x8xf32> to vector<2x8x8xf32>
    %c1_52 = arith.constant 1 : index
    %c0_53 = arith.constant 0 : index
    %c0_54 = arith.constant 0 : index
    %128 = vector.load %arg9[%c1_52, %c0_53, %c0_54] : memref<4x8x8xf32, #tpu.memory_space<vmem>>, vector<1x8x8xf32>
    %129 = vector.shape_cast %128 : vector<1x8x8xf32> to vector<8x8xf32>
    %c1_55 = arith.constant 1 : index
    %c0_56 = arith.constant 0 : index
    %c0_57 = arith.constant 0 : index
    %130 = vector.load %arg10[%c1_55, %c0_56, %c0_57] : memref<4x8x8xf32, #tpu.memory_space<vmem>>, vector<1x8x8xf32>
    %131 = vector.shape_cast %130 : vector<1x8x8xf32> to vector<8x8xf32>
    %c1_58 = arith.constant 1 : index
    %c0_59 = arith.constant 0 : index
    %c0_60 = arith.constant 0 : index
    %132 = vector.load %arg11[%c1_58, %c0_59, %c0_60] : memref<4x8x8xf32, #tpu.memory_space<vmem>>, vector<1x8x8xf32>
    %133 = vector.shape_cast %132 : vector<1x8x8xf32> to vector<8x8xf32>
    %c1_61 = arith.constant 1 : index
    %c0_62 = arith.constant 0 : index
    %c0_63 = arith.constant 0 : index
    %134 = vector.load %arg12[%c1_61, %c0_62, %c0_63] : memref<4x8x8xf32, #tpu.memory_space<vmem>>, vector<1x8x8xf32>
    %135 = vector.shape_cast %134 : vector<1x8x8xf32> to vector<8x8xf32>
    "tpu.trace_start"() <{level = 10 : i32, message = "bts,bus->btu"}> : () -> ()
    %cst_64 = arith.constant dense<0.000000e+00> : vector<2x8x8xf32>
    %136 = tpu.matmul %121, %123, %cst_64 {dimension_numbers = #tpu.dot_dimension_numbers<[2], [2], [1], [1], [0, 0, 0, 1, 1, 1], [0], [0]>} : vector<2x8x8xf32>, vector<2x8x8xf32>, vector<2x8x8xf32> -> vector<2x8x8xf32>
    "tpu.trace_stop"() : () -> ()
    %137 = vector.shape_cast %129 : vector<8x8xf32> to vector<1x8x8xf32>
    %138 = vector.broadcast %137 : vector<1x8x8xf32> to vector<2x8x8xf32>
    %139 = arith.mulf %136, %138 : vector<2x8x8xf32>
    "tpu.trace_start"() <{level = 10 : i32, message = "btu,bus->bts"}> : () -> ()
    %cst_65 = arith.constant dense<0.000000e+00> : vector<2x8x8xf32>
    %140 = tpu.matmul %139, %125, %cst_65 {dimension_numbers = #tpu.dot_dimension_numbers<[2], [1], [1], [2], [0, 0, 0, 1, 1, 2], [0], [0]>} : vector<2x8x8xf32>, vector<2x8x8xf32>, vector<2x8x8xf32> -> vector<2x8x8xf32>
    "tpu.trace_stop"() : () -> ()
    "tpu.trace_start"() <{level = 10 : i32, message = "bts,bsu->btu"}> : () -> ()
    %cst_66 = arith.constant dense<0.000000e+00> : vector<2x8x8xf32>
    %141 = tpu.matmul %121, %127, %cst_66 {dimension_numbers = #tpu.dot_dimension_numbers<[2], [1], [1], [2], [0, 0, 0, 1, 1, 2], [0], [0]>} : vector<2x8x8xf32>, vector<2x8x8xf32>, vector<2x8x8xf32> -> vector<2x8x8xf32>
    "tpu.trace_stop"() : () -> ()
    %142 = vector.shape_cast %133 : vector<8x8xf32> to vector<1x8x8xf32>
    %143 = vector.broadcast %142 : vector<1x8x8xf32> to vector<2x8x8xf32>
    %144 = arith.mulf %141, %143 : vector<2x8x8xf32>
    %145 = arith.addf %140, %144 : vector<2x8x8xf32>
    %146 = vector.shape_cast %135 : vector<8x8xf32> to vector<1x8x8xf32>
    %147 = vector.broadcast %146 : vector<1x8x8xf32> to vector<2x8x8xf32>
    %148 = arith.mulf %147, %127 : vector<2x8x8xf32>
    %149 = vector.shape_cast %131 : vector<8x8xf32> to vector<1x8x8xf32>
    %150 = vector.broadcast %149 : vector<1x8x8xf32> to vector<2x8x8xf32>
    %151 = arith.mulf %123, %150 : vector<2x8x8xf32>
    "tpu.trace_start"() <{level = 10 : i32, message = "bts,btu->bsu"}> : () -> ()
    %cst_67 = arith.constant dense<0.000000e+00> : vector<2x8x8xf32>
    %152 = tpu.matmul %151, %125, %cst_67 {dimension_numbers = #tpu.dot_dimension_numbers<[1], [1], [2], [2], [0, 0, 0, 2, 1, 2], [0], [0]>} : vector<2x8x8xf32>, vector<2x8x8xf32>, vector<2x8x8xf32> -> vector<2x8x8xf32>
    "tpu.trace_stop"() : () -> ()
    %153 = arith.addf %148, %152 : vector<2x8x8xf32>
    %c0_68 = arith.constant 0 : index
    %c1_69 = arith.constant 1 : index
    %c0_70 = arith.constant 0 : index
    %c0_71 = arith.constant 0 : index
    %154 = vector.load %arg14[%c0_68, %c1_69, %c0_70, %c0_71] : memref<2x4x8x8xf32, #tpu.memory_space<vmem>>, vector<2x1x8x8xf32>
    %155 = vector.shape_cast %154 : vector<2x1x8x8xf32> to vector<2x8x8xf32>
    %156 = vector.shape_cast %153 : vector<2x8x8xf32> to vector<2x1x8x8xf32>
    tpu.vector_store %arg14[%c0_68, %c1_69, %c0_70, %c0_71], %156 {strides = array<i32>} : memref<2x4x8x8xf32, #tpu.memory_space<vmem>>, vector<2x1x8x8xf32>,
    %cst_72 = arith.constant dense<0.000000e+00> : vector<2x8xf32>
    %157 = vector.multi_reduction <add>, %145, %cst_72 [2] : vector<2x8x8xf32> to vector<2x8xf32>
    %158 = vector.shape_cast %157 : vector<2x8xf32> to vector<2x8x1xf32>
    %cst_73 = arith.constant 8.000000e+00 : f32
    %159 = vector.broadcast %cst_73 : f32 to vector<2x8x1xf32>
    %160 = arith.divf %158, %159 : vector<2x8x1xf32>
    %161 = vector.broadcast %160 : vector<2x8x1xf32> to vector<2x8x8xf32>
    %162 = arith.subf %145, %161 : vector<2x8x8xf32>
    %163 = arith.mulf %162, %162 : vector<2x8x8xf32>
    %cst_74 = arith.constant dense<0.000000e+00> : vector<2x8xf32>
    %164 = vector.multi_reduction <add>, %163, %cst_74 [2] : vector<2x8x8xf32> to vector<2x8xf32>
    %165 = vector.shape_cast %164 : vector<2x8xf32> to vector<2x8x1xf32>
    %cst_75 = arith.constant 8.000000e+00 : f32
    %166 = vector.broadcast %cst_75 : f32 to vector<2x8x1xf32>
    %167 = arith.divf %165, %166 : vector<2x8x1xf32>
    %168 = vector.broadcast %160 : vector<2x8x1xf32> to vector<2x8x8xf32>
    %169 = arith.subf %145, %168 : vector<2x8x8xf32>
    %cst_76 = arith.constant 9.99999974E-6 : f32
    %170 = vector.broadcast %cst_76 : f32 to vector<2x8x1xf32>
    %171 = arith.addf %167, %170 : vector<2x8x1xf32>
    %172 = math.rsqrt %171 : vector<2x8x1xf32>
    %173 = vector.broadcast %172 : vector<2x8x1xf32> to vector<2x8x8xf32>
    %174 = arith.mulf %169, %173 : vector<2x8x8xf32>
    %175 = vector.shape_cast %174 : vector<2x8x8xf32> to vector<16x8xf32>
    %c0_77 = arith.constant 0 : index
    %c8 = arith.constant 8 : index
    %176 = vector.load %arg17[%c0_77, %c8] : memref<16x32xf32, #tpu.memory_space<vmem>>, vector<16x8xf32>
    tpu.vector_store %arg17[%c0_77, %c8], %175 {strides = array<i32>} : memref<16x32xf32, #tpu.memory_space<vmem>>, vector<16x8xf32>,
    %177 = vector.extract_strided_slice %62 {offsets = [0, 16], sizes = [16, 8], strides = [1, 1]} : vector<16x96xf32> to vector<16x8xf32>
    %178 = vector.shape_cast %177 : vector<16x8xf32> to vector<2x8x8xf32>
    %179 = vector.extract_strided_slice %62 {offsets = [0, 48], sizes = [16, 8], strides = [1, 1]} : vector<16x96xf32> to vector<16x8xf32>
    %180 = vector.shape_cast %179 : vector<16x8xf32> to vector<2x8x8xf32>
    %181 = vector.extract_strided_slice %62 {offsets = [0, 80], sizes = [16, 8], strides = [1, 1]} : vector<16x96xf32> to vector<16x8xf32>
    %182 = vector.shape_cast %181 : vector<16x8xf32> to vector<2x8x8xf32>
    %c0_78 = arith.constant 0 : index
    %c2 = arith.constant 2 : index
    %c0_79 = arith.constant 0 : index
    %c0_80 = arith.constant 0 : index
    %183 = vector.load %arg2[%c0_78, %c2, %c0_79, %c0_80] : memref<2x4x8x8xf32, #tpu.memory_space<vmem>>, vector<2x1x8x8xf32>
    %184 = vector.shape_cast %183 : vector<2x1x8x8xf32> to vector<2x8x8xf32>
    %c2_81 = arith.constant 2 : index
    %c0_82 = arith.constant 0 : index
    %c0_83 = arith.constant 0 : index
    %185 = vector.load %arg9[%c2_81, %c0_82, %c0_83] : memref<4x8x8xf32, #tpu.memory_space<vmem>>, vector<1x8x8xf32>
    %186 = vector.shape_cast %185 : vector<1x8x8xf32> to vector<8x8xf32>
    %c2_84 = arith.constant 2 : index
    %c0_85 = arith.constant 0 : index
    %c0_86 = arith.constant 0 : index
    %187 = vector.load %arg10[%c2_84, %c0_85, %c0_86] : memref<4x8x8xf32, #tpu.memory_space<vmem>>, vector<1x8x8xf32>
    %188 = vector.shape_cast %187 : vector<1x8x8xf32> to vector<8x8xf32>
    %c2_87 = arith.constant 2 : index
    %c0_88 = arith.constant 0 : index
    %c0_89 = arith.constant 0 : index
    %189 = vector.load %arg11[%c2_87, %c0_88, %c0_89] : memref<4x8x8xf32, #tpu.memory_space<vmem>>, vector<1x8x8xf32>
    %190 = vector.shape_cast %189 : vector<1x8x8xf32> to vector<8x8xf32>
    %c2_90 = arith.constant 2 : index
    %c0_91 = arith.constant 0 : index
    %c0_92 = arith.constant 0 : index
    %191 = vector.load %arg12[%c2_90, %c0_91, %c0_92] : memref<4x8x8xf32, #tpu.memory_space<vmem>>, vector<1x8x8xf32>
    %192 = vector.shape_cast %191 : vector<1x8x8xf32> to vector<8x8xf32>
    "tpu.trace_start"() <{level = 10 : i32, message = "bts,bus->btu"}> : () -> ()
    %cst_93 = arith.constant dense<0.000000e+00> : vector<2x8x8xf32>
    %193 = tpu.matmul %178, %180, %cst_93 {dimension_numbers = #tpu.dot_dimension_numbers<[2], [2], [1], [1], [0, 0, 0, 1, 1, 1], [0], [0]>} : vector<2x8x8xf32>, vector<2x8x8xf32>, vector<2x8x8xf32> -> vector<2x8x8xf32>
    "tpu.trace_stop"() : () -> ()
    %194 = vector.shape_cast %186 : vector<8x8xf32> to vector<1x8x8xf32>
    %195 = vector.broadcast %194 : vector<1x8x8xf32> to vector<2x8x8xf32>
    %196 = arith.mulf %193, %195 : vector<2x8x8xf32>
    "tpu.trace_start"() <{level = 10 : i32, message = "btu,bus->bts"}> : () -> ()
    %cst_94 = arith.constant dense<0.000000e+00> : vector<2x8x8xf32>
    %197 = tpu.matmul %196, %182, %cst_94 {dimension_numbers = #tpu.dot_dimension_numbers<[2], [1], [1], [2], [0, 0, 0, 1, 1, 2], [0], [0]>} : vector<2x8x8xf32>, vector<2x8x8xf32>, vector<2x8x8xf32> -> vector<2x8x8xf32>
    "tpu.trace_stop"() : () -> ()
    "tpu.trace_start"() <{level = 10 : i32, message = "bts,bsu->btu"}> : () -> ()
    %cst_95 = arith.constant dense<0.000000e+00> : vector<2x8x8xf32>
    %198 = tpu.matmul %178, %184, %cst_95 {dimension_numbers = #tpu.dot_dimension_numbers<[2], [1], [1], [2], [0, 0, 0, 1, 1, 2], [0], [0]>} : vector<2x8x8xf32>, vector<2x8x8xf32>, vector<2x8x8xf32> -> vector<2x8x8xf32>
    "tpu.trace_stop"() : () -> ()
    %199 = vector.shape_cast %190 : vector<8x8xf32> to vector<1x8x8xf32>
    %200 = vector.broadcast %199 : vector<1x8x8xf32> to vector<2x8x8xf32>
    %201 = arith.mulf %198, %200 : vector<2x8x8xf32>
    %202 = arith.addf %197, %201 : vector<2x8x8xf32>
    %203 = vector.shape_cast %192 : vector<8x8xf32> to vector<1x8x8xf32>
    %204 = vector.broadcast %203 : vector<1x8x8xf32> to vector<2x8x8xf32>
    %205 = arith.mulf %204, %184 : vector<2x8x8xf32>
    %206 = vector.shape_cast %188 : vector<8x8xf32> to vector<1x8x8xf32>
    %207 = vector.broadcast %206 : vector<1x8x8xf32> to vector<2x8x8xf32>
    %208 = arith.mulf %180, %207 : vector<2x8x8xf32>
    "tpu.trace_start"() <{level = 10 : i32, message = "bts,btu->bsu"}> : () -> ()
    %cst_96 = arith.constant dense<0.000000e+00> : vector<2x8x8xf32>
    %209 = tpu.matmul %208, %182, %cst_96 {dimension_numbers = #tpu.dot_dimension_numbers<[1], [1], [2], [2], [0, 0, 0, 2, 1, 2], [0], [0]>} : vector<2x8x8xf32>, vector<2x8x8xf32>, vector<2x8x8xf32> -> vector<2x8x8xf32>
    "tpu.trace_stop"() : () -> ()
    %210 = arith.addf %205, %209 : vector<2x8x8xf32>
    %c0_97 = arith.constant 0 : index
    %c2_98 = arith.constant 2 : index
    %c0_99 = arith.constant 0 : index
    %c0_100 = arith.constant 0 : index
    %211 = vector.load %arg14[%c0_97, %c2_98, %c0_99, %c0_100] : memref<2x4x8x8xf32, #tpu.memory_space<vmem>>, vector<2x1x8x8xf32>
    %212 = vector.shape_cast %211 : vector<2x1x8x8xf32> to vector<2x8x8xf32>
    %213 = vector.shape_cast %210 : vector<2x8x8xf32> to vector<2x1x8x8xf32>
    tpu.vector_store %arg14[%c0_97, %c2_98, %c0_99, %c0_100], %213 {strides = array<i32>} : memref<2x4x8x8xf32, #tpu.memory_space<vmem>>, vector<2x1x8x8xf32>,
    %cst_101 = arith.constant dense<0.000000e+00> : vector<2x8xf32>
    %214 = vector.multi_reduction <add>, %202, %cst_101 [2] : vector<2x8x8xf32> to vector<2x8xf32>
    %215 = vector.shape_cast %214 : vector<2x8xf32> to vector<2x8x1xf32>
    %cst_102 = arith.constant 8.000000e+00 : f32
    %216 = vector.broadcast %cst_102 : f32 to vector<2x8x1xf32>
    %217 = arith.divf %215, %216 : vector<2x8x1xf32>
    %218 = vector.broadcast %217 : vector<2x8x1xf32> to vector<2x8x8xf32>
    %219 = arith.subf %202, %218 : vector<2x8x8xf32>
    %220 = arith.mulf %219, %219 : vector<2x8x8xf32>
    %cst_103 = arith.constant dense<0.000000e+00> : vector<2x8xf32>
    %221 = vector.multi_reduction <add>, %220, %cst_103 [2] : vector<2x8x8xf32> to vector<2x8xf32>
    %222 = vector.shape_cast %221 : vector<2x8xf32> to vector<2x8x1xf32>
    %cst_104 = arith.constant 8.000000e+00 : f32
    %223 = vector.broadcast %cst_104 : f32 to vector<2x8x1xf32>
    %224 = arith.divf %222, %223 : vector<2x8x1xf32>
    %225 = vector.broadcast %217 : vector<2x8x1xf32> to vector<2x8x8xf32>
    %226 = arith.subf %202, %225 : vector<2x8x8xf32>
    %cst_105 = arith.constant 9.99999974E-6 : f32
    %227 = vector.broadcast %cst_105 : f32 to vector<2x8x1xf32>
    %228 = arith.addf %224, %227 : vector<2x8x1xf32>
    %229 = math.rsqrt %228 : vector<2x8x1xf32>
    %230 = vector.broadcast %229 : vector<2x8x1xf32> to vector<2x8x8xf32>
    %231 = arith.mulf %226, %230 : vector<2x8x8xf32>
    %232 = vector.shape_cast %231 : vector<2x8x8xf32> to vector<16x8xf32>
    %c0_106 = arith.constant 0 : index
    %c16 = arith.constant 16 : index
    %233 = vector.load %arg17[%c0_106, %c16] : memref<16x32xf32, #tpu.memory_space<vmem>>, vector<16x8xf32>
    tpu.vector_store %arg17[%c0_106, %c16], %232 {strides = array<i32>} : memref<16x32xf32, #tpu.memory_space<vmem>>, vector<16x8xf32>,
    %234 = vector.extract_strided_slice %62 {offsets = [0, 24], sizes = [16, 8], strides = [1, 1]} : vector<16x96xf32> to vector<16x8xf32>
    %235 = vector.shape_cast %234 : vector<16x8xf32> to vector<2x8x8xf32>
    %236 = vector.extract_strided_slice %62 {offsets = [0, 56], sizes = [16, 8], strides = [1, 1]} : vector<16x96xf32> to vector<16x8xf32>
    %237 = vector.shape_cast %236 : vector<16x8xf32> to vector<2x8x8xf32>
    %238 = vector.extract_strided_slice %62 {offsets = [0, 88], sizes = [16, 8], strides = [1, 1]} : vector<16x96xf32> to vector<16x8xf32>
    %239 = vector.shape_cast %238 : vector<16x8xf32> to vector<2x8x8xf32>
    %c0_107 = arith.constant 0 : index
    %c3 = arith.constant 3 : index
    %c0_108 = arith.constant 0 : index
    %c0_109 = arith.constant 0 : index
    %240 = vector.load %arg2[%c0_107, %c3, %c0_108, %c0_109] : memref<2x4x8x8xf32, #tpu.memory_space<vmem>>, vector<2x1x8x8xf32>
    %241 = vector.shape_cast %240 : vector<2x1x8x8xf32> to vector<2x8x8xf32>
    %c3_110 = arith.constant 3 : index
    %c0_111 = arith.constant 0 : index
    %c0_112 = arith.constant 0 : index
    %242 = vector.load %arg9[%c3_110, %c0_111, %c0_112] : memref<4x8x8xf32, #tpu.memory_space<vmem>>, vector<1x8x8xf32>
    %243 = vector.shape_cast %242 : vector<1x8x8xf32> to vector<8x8xf32>
    %c3_113 = arith.constant 3 : index
    %c0_114 = arith.constant 0 : index
    %c0_115 = arith.constant 0 : index
    %244 = vector.load %arg10[%c3_113, %c0_114, %c0_115] : memref<4x8x8xf32, #tpu.memory_space<vmem>>, vector<1x8x8xf32>
    %245 = vector.shape_cast %244 : vector<1x8x8xf32> to vector<8x8xf32>
    %c3_116 = arith.constant 3 : index
    %c0_117 = arith.constant 0 : index
    %c0_118 = arith.constant 0 : index
    %246 = vector.load %arg11[%c3_116, %c0_117, %c0_118] : memref<4x8x8xf32, #tpu.memory_space<vmem>>, vector<1x8x8xf32>
    %247 = vector.shape_cast %246 : vector<1x8x8xf32> to vector<8x8xf32>
    %c3_119 = arith.constant 3 : index
    %c0_120 = arith.constant 0 : index
    %c0_121 = arith.constant 0 : index
    %248 = vector.load %arg12[%c3_119, %c0_120, %c0_121] : memref<4x8x8xf32, #tpu.memory_space<vmem>>, vector<1x8x8xf32>
    %249 = vector.shape_cast %248 : vector<1x8x8xf32> to vector<8x8xf32>
    "tpu.trace_start"() <{level = 10 : i32, message = "bts,bus->btu"}> : () -> ()
    %cst_122 = arith.constant dense<0.000000e+00> : vector<2x8x8xf32>
    %250 = tpu.matmul %235, %237, %cst_122 {dimension_numbers = #tpu.dot_dimension_numbers<[2], [2], [1], [1], [0, 0, 0, 1, 1, 1], [0], [0]>} : vector<2x8x8xf32>, vector<2x8x8xf32>, vector<2x8x8xf32> -> vector<2x8x8xf32>
    "tpu.trace_stop"() : () -> ()
    %251 = vector.shape_cast %243 : vector<8x8xf32> to vector<1x8x8xf32>
    %252 = vector.broadcast %251 : vector<1x8x8xf32> to vector<2x8x8xf32>
    %253 = arith.mulf %250, %252 : vector<2x8x8xf32>
    "tpu.trace_start"() <{level = 10 : i32, message = "btu,bus->bts"}> : () -> ()
    %cst_123 = arith.constant dense<0.000000e+00> : vector<2x8x8xf32>
    %254 = tpu.matmul %253, %239, %cst_123 {dimension_numbers = #tpu.dot_dimension_numbers<[2], [1], [1], [2], [0, 0, 0, 1, 1, 2], [0], [0]>} : vector<2x8x8xf32>, vector<2x8x8xf32>, vector<2x8x8xf32> -> vector<2x8x8xf32>
    "tpu.trace_stop"() : () -> ()
    "tpu.trace_start"() <{level = 10 : i32, message = "bts,bsu->btu"}> : () -> ()
    %cst_124 = arith.constant dense<0.000000e+00> : vector<2x8x8xf32>
    %255 = tpu.matmul %235, %241, %cst_124 {dimension_numbers = #tpu.dot_dimension_numbers<[2], [1], [1], [2], [0, 0, 0, 1, 1, 2], [0], [0]>} : vector<2x8x8xf32>, vector<2x8x8xf32>, vector<2x8x8xf32> -> vector<2x8x8xf32>
    "tpu.trace_stop"() : () -> ()
    %256 = vector.shape_cast %247 : vector<8x8xf32> to vector<1x8x8xf32>
    %257 = vector.broadcast %256 : vector<1x8x8xf32> to vector<2x8x8xf32>
    %258 = arith.mulf %255, %257 : vector<2x8x8xf32>
    %259 = arith.addf %254, %258 : vector<2x8x8xf32>
    %260 = vector.shape_cast %249 : vector<8x8xf32> to vector<1x8x8xf32>
    %261 = vector.broadcast %260 : vector<1x8x8xf32> to vector<2x8x8xf32>
    %262 = arith.mulf %261, %241 : vector<2x8x8xf32>
    %263 = vector.shape_cast %245 : vector<8x8xf32> to vector<1x8x8xf32>
    %264 = vector.broadcast %263 : vector<1x8x8xf32> to vector<2x8x8xf32>
    %265 = arith.mulf %237, %264 : vector<2x8x8xf32>
    "tpu.trace_start"() <{level = 10 : i32, message = "bts,btu->bsu"}> : () -> ()
    %cst_125 = arith.constant dense<0.000000e+00> : vector<2x8x8xf32>
    %266 = tpu.matmul %265, %239, %cst_125 {dimension_numbers = #tpu.dot_dimension_numbers<[1], [1], [2], [2], [0, 0, 0, 2, 1, 2], [0], [0]>} : vector<2x8x8xf32>, vector<2x8x8xf32>, vector<2x8x8xf32> -> vector<2x8x8xf32>
    "tpu.trace_stop"() : () -> ()
    %267 = arith.addf %262, %266 : vector<2x8x8xf32>
    %c0_126 = arith.constant 0 : index
    %c3_127 = arith.constant 3 : index
    %c0_128 = arith.constant 0 : index
    %c0_129 = arith.constant 0 : index
    %268 = vector.load %arg14[%c0_126, %c3_127, %c0_128, %c0_129] : memref<2x4x8x8xf32, #tpu.memory_space<vmem>>, vector<2x1x8x8xf32>
    %269 = vector.shape_cast %268 : vector<2x1x8x8xf32> to vector<2x8x8xf32>
    %270 = vector.shape_cast %267 : vector<2x8x8xf32> to vector<2x1x8x8xf32>
    tpu.vector_store %arg14[%c0_126, %c3_127, %c0_128, %c0_129], %270 {strides = array<i32>} : memref<2x4x8x8xf32, #tpu.memory_space<vmem>>, vector<2x1x8x8xf32>,
    %cst_130 = arith.constant dense<0.000000e+00> : vector<2x8xf32>
    %271 = vector.multi_reduction <add>, %259, %cst_130 [2] : vector<2x8x8xf32> to vector<2x8xf32>
    %272 = vector.shape_cast %271 : vector<2x8xf32> to vector<2x8x1xf32>
    %cst_131 = arith.constant 8.000000e+00 : f32
    %273 = vector.broadcast %cst_131 : f32 to vector<2x8x1xf32>
    %274 = arith.divf %272, %273 : vector<2x8x1xf32>
    %275 = vector.broadcast %274 : vector<2x8x1xf32> to vector<2x8x8xf32>
    %276 = arith.subf %259, %275 : vector<2x8x8xf32>
    %277 = arith.mulf %276, %276 : vector<2x8x8xf32>
    %cst_132 = arith.constant dense<0.000000e+00> : vector<2x8xf32>
    %278 = vector.multi_reduction <add>, %277, %cst_132 [2] : vector<2x8x8xf32> to vector<2x8xf32>
    %279 = vector.shape_cast %278 : vector<2x8xf32> to vector<2x8x1xf32>
    %cst_133 = arith.constant 8.000000e+00 : f32
    %280 = vector.broadcast %cst_133 : f32 to vector<2x8x1xf32>
    %281 = arith.divf %279, %280 : vector<2x8x1xf32>
    %282 = vector.broadcast %274 : vector<2x8x1xf32> to vector<2x8x8xf32>
    %283 = arith.subf %259, %282 : vector<2x8x8xf32>
    %cst_134 = arith.constant 9.99999974E-6 : f32
    %284 = vector.broadcast %cst_134 : f32 to vector<2x8x1xf32>
    %285 = arith.addf %281, %284 : vector<2x8x1xf32>
    %286 = math.rsqrt %285 : vector<2x8x1xf32>
    %287 = vector.broadcast %286 : vector<2x8x1xf32> to vector<2x8x8xf32>
    %288 = arith.mulf %283, %287 : vector<2x8x8xf32>
    %289 = vector.shape_cast %288 : vector<2x8x8xf32> to vector<16x8xf32>
    %c0_135 = arith.constant 0 : index
    %c24 = arith.constant 24 : index
    %290 = vector.load %arg17[%c0_135, %c24] : memref<16x32xf32, #tpu.memory_space<vmem>>, vector<16x8xf32>
    tpu.vector_store %arg17[%c0_135, %c24], %289 {strides = array<i32>} : memref<16x32xf32, #tpu.memory_space<vmem>>, vector<16x8xf32>,
    %c0_136 = arith.constant 0 : index
    %c0_137 = arith.constant 0 : index
    %291 = vector.load %arg17[%c0_136, %c0_137] : memref<16x32xf32, #tpu.memory_space<vmem>>, vector<16x32xf32>
    %292 = arith.truncf %291 : vector<16x32xf32> to vector<16x32xbf16>
    %c0_138 = arith.constant 0 : index
    %c0_139 = arith.constant 0 : index
    %293 = vector.load %arg6[%c0_138, %c0_139] : memref<32x32xbf16, #tpu.memory_space<vmem>>, vector<32x32xbf16>
    %cst_140 = arith.constant dense<0.000000e+00> : vector<16x32xf32>
    %294 = tpu.matmul %292, %293, %cst_140 {dimension_numbers = #tpu.dot_dimension_numbers<[1], [0], [0], [1], [0, 0, 1, 1], [], []>} : vector<16x32xbf16>, vector<32x32xbf16>, vector<16x32xf32> -> vector<16x32xf32>
    %295 = vector.extract_strided_slice %0 {offsets = [6, 0], sizes = [1, 32], strides = [1, 1]} : vector<8x32xf32> to vector<1x32xf32>
    %296 = vector.broadcast %295 : vector<1x32xf32> to vector<16x32xf32>
    %297 = arith.addf %294, %296 : vector<16x32xf32>
    %298 = vector.extract_strided_slice %53 {offsets = [0, 7, 0], sizes = [2, 1, 32], strides = [1, 1, 1]} : vector<2x8x32xf32> to vector<2x1x32xf32>
    %299 = vector.shape_cast %298 : vector<2x1x32xf32> to vector<2x32xf32>
    %c0_141 = arith.constant 0 : index
    %c0_142 = arith.constant 0 : index
    %300 = vector.load %arg15[%c0_141, %c0_142] : memref<2x32xf32, #tpu.memory_space<vmem>>, vector<2x32xf32>
    tpu.vector_store %arg15[%c0_141, %c0_142], %299 {strides = array<i32>} : memref<2x32xf32, #tpu.memory_space<vmem>>, vector<2x32xf32>,
    %301 = vector.shape_cast %297 : vector<16x32xf32> to vector<2x8x32xf32>
    %302 = arith.addf %27, %301 : vector<2x8x32xf32>
    %303 = vector.extract_strided_slice %0 {offsets = [4, 0], sizes = [1, 32], strides = [1, 1]} : vector<8x32xf32> to vector<1x32xf32>
    %304 = vector.extract_strided_slice %0 {offsets = [5, 0], sizes = [1, 32], strides = [1, 1]} : vector<8x32xf32> to vector<1x32xf32>
    %cst_143 = arith.constant dense<0.000000e+00> : vector<2x8xf32>
    %305 = vector.multi_reduction <add>, %302, %cst_143 [2] : vector<2x8x32xf32> to vector<2x8xf32>
    %306 = vector.shape_cast %305 : vector<2x8xf32> to vector<2x8x1xf32>
    %cst_144 = arith.constant 3.200000e+01 : f32
    %307 = vector.broadcast %cst_144 : f32 to vector<2x8x1xf32>
    %308 = arith.divf %306, %307 : vector<2x8x1xf32>
    %309 = vector.broadcast %308 : vector<2x8x1xf32> to vector<2x8x32xf32>
    %310 = arith.subf %302, %309 : vector<2x8x32xf32>
    %311 = arith.mulf %310, %310 : vector<2x8x32xf32>
    %cst_145 = arith.constant dense<0.000000e+00> : vector<2x8xf32>
    %312 = vector.multi_reduction <add>, %311, %cst_145 [2] : vector<2x8x32xf32> to vector<2x8xf32>
    %313 = vector.shape_cast %312 : vector<2x8xf32> to vector<2x8x1xf32>
    %cst_146 = arith.constant 3.200000e+01 : f32
    %314 = vector.broadcast %cst_146 : f32 to vector<2x8x1xf32>
    %315 = arith.divf %313, %314 : vector<2x8x1xf32>
    %316 = vector.broadcast %308 : vector<2x8x1xf32> to vector<2x8x32xf32>
    %317 = arith.subf %302, %316 : vector<2x8x32xf32>
    %cst_147 = arith.constant 9.99999974E-6 : f32
    %318 = vector.broadcast %cst_147 : f32 to vector<2x8x1xf32>
    %319 = arith.addf %315, %318 : vector<2x8x1xf32>
    %320 = math.rsqrt %319 : vector<2x8x1xf32>
    %321 = vector.broadcast %320 : vector<2x8x1xf32> to vector<2x8x32xf32>
    %322 = arith.mulf %317, %321 : vector<2x8x32xf32>
    %323 = vector.shape_cast %303 : vector<1x32xf32> to vector<1x1x32xf32>
    %324 = vector.broadcast %323 : vector<1x1x32xf32> to vector<2x8x32xf32>
    %325 = arith.mulf %322, %324 : vector<2x8x32xf32>
    %326 = vector.shape_cast %304 : vector<1x32xf32> to vector<1x1x32xf32>
    %327 = vector.broadcast %326 : vector<1x1x32xf32> to vector<2x8x32xf32>
    %328 = arith.addf %325, %327 : vector<2x8x32xf32>
    %c0_148 = arith.constant 0 : index
    %c0_149 = arith.constant 0 : index
    %329 = vector.load %arg3[%c0_148, %c0_149] : memref<2x32xf32, #tpu.memory_space<vmem>>, vector<2x32xf32>
    %330 = vector.shape_cast %329 : vector<2x32xf32> to vector<2x1x32xf32>
    %331 = vector.extract_strided_slice %328 {offsets = [0, 0, 0], sizes = [2, 7, 32], strides = [1, 1, 1]} : vector<2x8x32xf32> to vector<2x7x32xf32>
    %332 = tpu.concatenate %330, %331 in 1 : vector<2x1x32xf32>, vector<2x7x32xf32> -> vector<2x8x32xf32>
    %333 = tpu.concatenate %328, %332 in 2 : vector<2x8x32xf32>, vector<2x8x32xf32> -> vector<2x8x64xf32>
    %334 = vector.shape_cast %333 : vector<2x8x64xf32> to vector<16x64xf32>
    %335 = arith.truncf %334 : vector<16x64xf32> to vector<16x64xbf16>
    %c0_150 = arith.constant 0 : index
    %c0_151 = arith.constant 0 : index
    %336 = vector.load %arg7[%c0_150, %c0_151] : memref<64x96xbf16, #tpu.memory_space<vmem>>, vector<64x96xbf16>
    %cst_152 = arith.constant dense<0.000000e+00> : vector<16x96xf32>
    %337 = tpu.matmul %335, %336, %cst_152 {dimension_numbers = #tpu.dot_dimension_numbers<[1], [0], [0], [1], [0, 0, 1, 1], [], []>} : vector<16x64xbf16>, vector<64x96xbf16>, vector<16x96xf32> -> vector<16x96xf32>
    %338 = vector.extract_strided_slice %337 {offsets = [0, 0], sizes = [16, 64], strides = [1, 1]} : vector<16x96xf32> to vector<16x64xf32>
    %cst_153 = arith.constant 0.000000e+00 : f32
    %339 = vector.broadcast %cst_153 : f32 to vector<16x64xf32>
    %340 = arith.maximumf %338, %339 : vector<16x64xf32>
    %341 = arith.mulf %340, %340 : vector<16x64xf32>
    %342 = arith.truncf %341 : vector<16x64xf32> to vector<16x64xbf16>
    %c0_154 = arith.constant 0 : index
    %c0_155 = arith.constant 0 : index
    %343 = vector.load %arg8[%c0_154, %c0_155] : memref<64x32xbf16, #tpu.memory_space<vmem>>, vector<64x32xbf16>
    %cst_156 = arith.constant dense<0.000000e+00> : vector<16x32xf32>
    %344 = tpu.matmul %342, %343, %cst_156 {dimension_numbers = #tpu.dot_dimension_numbers<[1], [0], [0], [1], [0, 0, 1, 1], [], []>} : vector<16x64xbf16>, vector<64x32xbf16>, vector<16x32xf32> -> vector<16x32xf32>
    %345 = vector.extract_strided_slice %337 {offsets = [0, 64], sizes = [16, 32], strides = [1, 1]} : vector<16x96xf32> to vector<16x32xf32>
    %346 = arith.negf %345 : vector<16x32xf32>
    %347 = math.exp %346 : vector<16x32xf32>
    %cst_157 = arith.constant 1.000000e+00 : f32
    %348 = vector.broadcast %cst_157 : f32 to vector<16x32xf32>
    %349 = arith.addf %348, %347 : vector<16x32xf32>
    %350 = arith.divf %348, %349 : vector<16x32xf32>
    %351 = arith.mulf %350, %344 : vector<16x32xf32>
    %352 = vector.extract_strided_slice %328 {offsets = [0, 7, 0], sizes = [2, 1, 32], strides = [1, 1, 1]} : vector<2x8x32xf32> to vector<2x1x32xf32>
    %353 = vector.shape_cast %352 : vector<2x1x32xf32> to vector<2x32xf32>
    %c0_158 = arith.constant 0 : index
    %c0_159 = arith.constant 0 : index
    %354 = vector.load %arg16[%c0_158, %c0_159] : memref<2x32xf32, #tpu.memory_space<vmem>>, vector<2x32xf32>
    tpu.vector_store %arg16[%c0_158, %c0_159], %353 {strides = array<i32>} : memref<2x32xf32, #tpu.memory_space<vmem>>, vector<2x32xf32>,
    %355 = vector.shape_cast %351 : vector<16x32xf32> to vector<2x8x32xf32>
    %356 = arith.addf %302, %355 : vector<2x8x32xf32>
    %c0_160 = arith.constant 0 : index
    %c0_161 = arith.constant 0 : index
    %c0_162 = arith.constant 0 : index
    %357 = vector.load %arg13[%c0_160, %c0_161, %c0_162] : memref<2x8x32xf32, #tpu.memory_space<vmem>>, vector<2x8x32xf32>
    tpu.vector_store %arg13[%c0_160, %c0_161, %c0_162], %356 {strides = array<i32>} : memref<2x8x32xf32, #tpu.memory_space<vmem>>, vector<2x8x32xf32>,
    return
  }
}

</mosaic_0001>

<bundles_post_ra>
// kernel: tpu_custom_call.1
= control target key start
LH: loop header
LB: loop body
LE: loop exit
PB: predicated region body
PF: predicated region fallthrough
CT: control target
= control target key end

     0   :  { %s4976_s0 = inlined_call_operand.vmem [shape: f32[2,8,32], index: 0, kind: input, shape index: {}]   ;;  %s4977_s1 = inlined_call_operand.hbm [shape: f32[2,32], index: 1, kind: input, shape index: {}, may-alias: {1,15}]   ;;  %s4978_s2 = inlined_call_operand.hbm [shape: f32[2,4,8,8], index: 2, kind: input, shape index: {}, may-alias: {2,14}]   ;;  %s4979_s3 = inlined_call_operand.hbm [shape: f32[2,32], index: 3, kind: input, shape index: {}, may-alias: {3,16}]   ;;  %s4980_s4 = inlined_call_operand.hbm [shape: f32[8,32], index: 4, kind: input, shape index: {}]   ;;  %s4981_s5 = inlined_call_operand.vmem [shape: bf16[64,96], index: 5, kind: input, shape index: {}]   ;;  %s4982_s6 = inlined_call_operand.hbm [shape: bf16[32,32], index: 6, kind: input, shape index: {}]   ;;  %s4983_s7 = inlined_call_operand.vmem [shape: bf16[64,96], index: 7, kind: input, shape index: {}]   ;;  %s4984_s8 = inlined_call_operand.vmem [shape: bf16[64,32], index: 8, kind: input, shape index: {}]   ;;  %s4985_s9 = inlined_call_operand.vmem [shape: f32[4,8,8], index: 9, kind: input, shape index: {}]   ;;  %s4986_s10 = inlined_call_operand.vmem [shape: f32[4,8,8], index: 10, kind: input, shape index: {}]   ;;  %s4987_s11 = inlined_call_operand.vmem [shape: f32[4,8,8], index: 11, kind: input, shape index: {}]   ;;  %s4988_s12 = inlined_call_operand.hbm [shape: f32[4,8,8], index: 12, kind: input, shape index: {}]   ;;  %s4989_s13 = inlined_call_operand.hbm [shape: f32[2,8,32], index: 13, kind: output, shape index: {0}]   ;;  %s4990_s14 = inlined_call_operand.hbm [shape: f32[2,4,8,8], index: 14, kind: output, shape index: {1}, may-alias: {2,14}]   ;;  %s4991_s15 = inlined_call_operand.hbm [shape: f32[2,32], index: 15, kind: output, shape index: {2}, may-alias: {1,15}]   ;;  %s4992_s16 = inlined_call_operand.hbm [shape: f32[2,32], index: 16, kind: output, shape index: {3}, may-alias: {3,16}]  }
   0x1   :  { %4994 = sst [smem:[#allocation27_spill]] %s4976_s0 }
   0x2   :  { %22 = vsyncpa [#allocation4], 0 }
   0x3   :  { %23 = vsyncpa [#allocation7], 0 }
   0x4   :  { %24 = vsyncpa [#allocation10], 0 }
   0x5   :  { %25 = vsyncpa [#allocation13], 0 }
   0x6   :  { %26 = vsyncpa [#allocation5], 0 }
   0x7   :  { %27 = vsyncpa [#allocation16], 0 }
   0x8   :  { %28 = vsyncpa [#allocation19], 0  ;;  %s4317_s21 = smov [#allocation6]  }
   0x9   :  { %s46_s22 = sshll.u32 %s4317_s21, 4  ;;  %s47_s22 = int_to_ptr.vmem [resolvable:$true] %s46_s22 }
   0xa   :  { %s4111_s23 = scalar_lea.vmem %s47_s22, 1024  ;;  %p4116_p1 = scmp.lt.s32.totalorder %s47_s22, %s47_s22 }
   0xb   :  { %p4112_p0 = scmp.ne.s32.totalorder %s47_s22, %s4111_s23  ;;  %p4117_p2 = scmp.lt.s32.totalorder %s4111_s23, %s4111_s23 }
   0xd   :  { %p4118_p3 = por %p4117_p2, %p4116_p1 }
   0xf   :  { %p4119_p4 = pnand %p4118_p3, %p4112_p0 }
  0x11   :  { %4122 = shalt.err (!%p4119_p4)
}
  0x12   :  { %s4318_s24 = smov 128   ;;  %s4319_s25 = smov 8  }
  0x13   :  { %52 = dma.hbm_to_vmem [thread:$0]  %s4978_s2, 1024, %s47_s22, [#allocation7], %s4318_s24, %s4318_s24, %s4319_s25  }
  0x14   :  { %s4320_s28 = smov [#allocation9]   ;;  %s4321_s30 = smov [#allocation3]  }
  0x15   :  { %s69_s29 = sshll.u32 %s4320_s28, 4  ;;  %s37_s0 = sshll.u32 %s4321_s30, 4  ;;  %s70_s29 = int_to_ptr.vmem [resolvable:$true] %s69_s29  ;;  %s38_s0 = int_to_ptr.vmem [resolvable:$true] %s37_s0 }
  0x16   :  { %s4131_s17 = scalar_lea.vmem %s70_s29, 128  ;;  %p4136_p6 = scmp.lt.s32.totalorder %s70_s29, %s70_s29 }
  0x17   :  { %p4132_p5 = scmp.ne.s32.totalorder %s70_s29, %s4131_s17  ;;  %p4137_p7 = scmp.lt.s32.totalorder %s4131_s17, %s4131_s17 }
  0x19   :  { %p4138_p8 = por %p4137_p7, %p4136_p6 }
  0x1b   :  { %p4139_p9 = pnand %p4138_p8, %p4132_p5 }
  0x1d   :  { %4142 = shalt.err (!%p4139_p9)
}
  0x1e   :  { %72 = dma.hbm_to_vmem [thread:$0]  %s4980_s4, 128, %s70_s29, [#allocation10]  }
  0x1f   :  { %s4151_s20 = scalar_lea.vmem %s38_s0, 32  ;;  %p4156_p11 = scmp.lt.s32.totalorder %s38_s0, %s38_s0 }
  0x20   :  { %p4152_p10 = scmp.ne.s32.totalorder %s38_s0, %s4151_s20  ;;  %p4157_p12 = scmp.lt.s32.totalorder %s4151_s20, %s4151_s20 }
  0x22   :  { %p4158_p13 = por %p4157_p12, %p4156_p11 }
  0x24   :  { %p4159_p0 = pnand %p4158_p13, %p4152_p10 }
  0x26   :  { %4162 = shalt.err (!%p4159_p0)
}
  0x27   :  { %40 = dma.hbm_to_vmem [thread:$0]  %s4977_s1, 32, %s38_s0, [#allocation4]  }
  0x28   :  { %s4322_s22 = smov [#allocation8]   ;;  %s4323_s26 = smov [#allocation11]  }
  0x29   :  { %s59_s23 = sshll.u32 %s4322_s22, 4  ;;  %s80_s27 = sshll.u32 %s4323_s26, 4  ;;  %s60_s23 = int_to_ptr.vmem [resolvable:$true] %s59_s23  ;;  %s81_s27 = int_to_ptr.vmem [resolvable:$true] %s80_s27 }
  0x2a   :  { %s4171_s28 = scalar_lea.vmem %s60_s23, 32  ;;  %p4176_p2 = scmp.lt.s32.totalorder %s60_s23, %s60_s23 }
  0x2b   :  { %p4172_p1 = scmp.ne.s32.totalorder %s60_s23, %s4171_s28  ;;  %p4177_p3 = scmp.lt.s32.totalorder %s4171_s28, %s4171_s28 }
  0x2d   :  { %p4178_p4 = por %p4177_p3, %p4176_p2 }
  0x2f   :  { %p4179_p5 = pnand %p4178_p4, %p4172_p1 }
  0x31   :  { %4182 = shalt.err (!%p4179_p5)
}
  0x32   :  { %62 = dma.hbm_to_vmem [thread:$0]  %s4979_s3, 32, %s60_s23, [#allocation7]  }
  0x33   :  { %s4191_s30 = scalar_lea.vmem %s81_s27, 256  ;;  %p4196_p7 = scmp.lt.s32.totalorder %s81_s27, %s81_s27 }
  0x34   :  { %p4192_p6 = scmp.ne.s32.totalorder %s81_s27, %s4191_s30  ;;  %p4197_p8 = scmp.lt.s32.totalorder %s4191_s30, %s4191_s30 }
  0x36   :  { %p4198_p9 = por %p4197_p8, %p4196_p7 }
  0x38   :  { %p4199_p10 = pnand %p4198_p9, %p4192_p6 }
  0x3a   :  { %4202 = shalt.err (!%p4199_p10)
}
  0x3b   :  { %s4324_s1 = smov 64   ;;  %s4325_s0 = smov 4  }
  0x3c   :  { %86 = dma.hbm_to_vmem [thread:$0]  %s4982_s6, 256, %s81_s27, [#allocation10], %s4324_s1, %s4324_s1, %s4325_s0  }
  0x3d   :  { %s4326_s19 = smov [#allocation12]  }
  0x3e   :  { %s102_s20 = sshll.u32 %s4326_s19, 4  ;;  %s103_s20 = int_to_ptr.vmem [resolvable:$true] %s102_s20 }
  0x3f   :  { %s4211_s3 = scalar_lea.vmem %s103_s20, 512  ;;  %p4216_p12 = scmp.lt.s32.totalorder %s103_s20, %s103_s20 }
  0x40   :  { %p4212_p11 = scmp.ne.s32.totalorder %s103_s20, %s4211_s3  ;;  %p4217_p13 = scmp.lt.s32.totalorder %s4211_s3, %s4211_s3 }
  0x42   :  { %p4218_p0 = por %p4217_p13, %p4216_p12 }
  0x44   :  { %p4219_p1 = pnand %p4218_p0, %p4212_p11 }
  0x46   :  { %4222 = shalt.err (!%p4219_p1)
}
  0x47   :  { %108 = dma.hbm_to_vmem [thread:$0]  %s4988_s12, 512, %s103_s20, [#allocation13], %s4318_s24, %s4318_s24, %s4319_s25  }
  0x48   :  { %4303 = dma.done.wait [#allocation4], 32  }
  0x49   :  { %4304 = vsyncadd [#allocation4], 4294967264 }
  0x4a   :  { %4305 = dma.done.wait [#allocation7], 1056  }
  0x4b   :  { %4306 = vsyncadd [#allocation7], 4294966240 }
  0x4c   :  { %4307 = dma.done.wait [#allocation10], 384  }
  0x4d   :  { %4308 = vsyncadd [#allocation10], 4294966912 }
  0x4e   :  { %4309 = dma.done.wait [#allocation13], 512  }
  0x4f   :  { %4310 = vsyncadd [#allocation13], 4294966784  ;;  %vm131_vm0 = vcmask 261120   ;;  %s4995_s23 = sld [smem:[#allocation27_spill]]  ;;  %v159_v19 = vlaneseq  ;;  %v128_v23 = vld [vmem:[#allocation9] sm:$0xff]  ;;  %v4327_v48 = vmov 0.0  }
  0x50   :  { %v4052_v47 = vld [vmem:[%s4981_s5 + $0x18] sm:$0xff]   ;;  %3808 = vmatprep.subr.bf16.mxu0 %v4327_v48  ;;  %3820 = vmatprep.subr.mxu1 %v4327_v48  ;;  %v4053_v49 = vld [vmem:[%s4981_s5 + $0x10] sm:$0xff]   ;;  %v4054_v50 = vld [vmem:[%s4981_s5 + $0x8] sm:$0xff]   ;;  %v4328_v59 = vmov 1966171168   ;;  %vm3309_vm1 = vcmask 261127  }
  0x51   :  { %v4468_v21 = vshrl.u32 %v159_v19, 7  ;;  %3809 = vmatpush3.bf16.msra.mxu0 %v4052_v47  ;;  %v220_v60 = vunpack.c.l.s4 %v4328_v59  ;;  %vm4329_vm2 = vmmov 0   ;;  %vm241_vm3 = vcmask 1040384   ;;  %s4331_s19 = smov 96   ;;  %s4332_s2 = smov 88  }
  0x52   :  { %3810 = vmatprep.subr.bf16.mxu0 %v4327_v48  ;;  %3816 = vmatprep.mubr.msk.bf16.mxu0 %vm4329_vm2, %v4327_v48  ;;  %vm3311_vm4 = vcmask 253952   ;;  %vm287_vm5 = vcmask 523264   ;;  %vm341_vm6 = vcmask 64512   ;;  %s4333_s21 = smov 120   ;;  %s4335_s12 = smov 56   ;;  %vm1776_vm7 = vcmask 130112  }
  0x53   :  { %v161_v22 = vsub.s32 0, %v4468_v21  ;;  %v167_v24 = vsub.s32 1, %v4468_v21  ;;  %v199_v57 = vsub.s32 2, %v4468_v21  ;;  %v205_v58 = vsub.s32 3, %v4468_v21  ;;  %3822 = vmatprep.mubr.msk.f32.mxu1 %vm4329_vm2, %v4327_v48  ;;  %s4336_s28 = smov 80   ;;  %s4337_s4 = smov 112  }
  0x54   :  { %s4338_s18 = smov 48   ;;  %s4339_s3 = smov 72   ;;  %vm2507_vm8 = vcmask 195712   ;;  %vm3238_vm9 = vcmask 261312  }
  0x55   :  { %v129_v0 = vld [vmem:[%s4995_s23] sm:$0xff]  ;;  %v130_v1 = vld [vmem:[%s4995_s23 + $0x8] sm:$0xff]  ;;  %v162_v25 = vrot.slane %v128_v23, %v161_v22  ;;  %v168_v28 = vrot.slane %v128_v23, %v167_v24  ;;  %3811 = vmatpush3.bf16.msra.mxu0 %v4053_v49  ;;  %v200_v61 = vrot.slane %v128_v23, %v199_v57  ;;  %s4334_s23 = smov 40  }
  0x56   :  { %v132_v2 = vsel %vm131_vm0, %v129_v0, 0.0  ;;  %v135_v3 = vsel %vm131_vm0, %v130_v1, 0.0  ;;  %3812 = vmatprep.subr.bf16.mxu0 %v4327_v48 }
  0x57   :  { %133 = vadd.xlane.f32.xlu0 %v132_v2 }
  0x59   :  { %3813 = vmatpush3.bf16.msra.mxu0 %v4054_v50 }
  0x5a   :  { %3814 = vmatprep.subr.bf16.mxu0 %v4327_v48 }
  0x5b   :  { %136 = vadd.xlane.f32.xlu0 %v135_v3  ;;  %v4055_v3 = vld [vmem:[%s4981_s5] sm:$0xff]   ;;  %s4330_s5 = smov 32  }
  0x5d   :  { %3815 = vmatpush3.bf16.msra.mxu0 %v4055_v3 }
  0x5e   :  { %3845 = vmatprep.subr.mxu0 %v4327_v48 }
  0xe0   :  { %v134_v4 = vpop.xlane.xlu0 %133 }
  0xe1   :  { %v139_v5 = vmul.f32 0.03125, %v134_v4 }
  0xe3   :  { %v141_v6 = vsub.f32 %v129_v0, %v139_v5  ;;  %v206_v0 = vrot.slane %v128_v23, %v205_v58  ;;  %v3655_v5 = vld.sshfl [vmem:[#allocation3] sm:$0x11 pattern:$0x75316420] }
  0xe4   :  { %v137_v7 = vpop.xlane.xlu0 %136 }
  0xe5   :  { %v140_v8 = vmul.f32 0.03125, %v137_v7  ;;  %v143_v9 = vmul.f32 %v141_v6, %v141_v6 }
  0xe7   :  { %v142_v10 = vsub.f32 %v130_v1, %v140_v8  ;;  %v145_v11 = vsel %vm131_vm0, %v143_v9, 0.0  ;;  %v221_v1 = vunpack.c.0.s8 %v220_v60  ;;  %v218_v8 = vcombine.high %v3655_v5, %v3655_v5 }
  0xe8   :  { %146 = vadd.xlane.f32.xlu1 %v145_v11 }
  0xe9   :  { %v144_v12 = vmul.f32 %v142_v10, %v142_v10  ;;  %v4504_v9 = vsub.s32 %v221_v1, %v4468_v21 }
  0xeb   :  { %v148_v13 = vsel %vm131_vm0, %v144_v12, 0.0  ;;  %v225_v12 = vrot.slane %v3655_v5, %v4504_v9 }
  0xec   :  { %149 = vadd.xlane.f32.xlu1 %v148_v13  ;;  %v232_v13 = vrot.slane %v218_v8, %v4504_v9 }
 0x171   :  { %v147_v14 = vpop.xlane.xlu1 %146 }
 0x172   :  { %v151_v15 = vmul.f32 0.03125, %v147_v14 }
 0x174   :  { %v153_v16 = vadd.f32 1e-05, %v151_v15 }
 0x175   :  { %v150_v17 = vpop.xlane.xlu1 %149 }
 0x176   :  { %4066 = vrsqrt.f32 %v153_v16  ;;  %v152_v18 = vmul.f32 0.03125, %v150_v17 }
 0x178   :  { %v154_v20 = vadd.f32 1e-05, %v152_v18 }
 0x17a   :  { %4068 = vrsqrt.f32 %v154_v20 }
 0x183   :  { %v4067_v26 = vpop.eup %4066 }
 0x184   :  { %v157_v27 = vmul.f32 %v4067_v26, %v141_v6 }
 0x186   :  { %v163_v29 = vmul.f32 %v162_v25, %v157_v27 }
 0x187   :  { %v4069_v30 = vpop.eup %4068 }
 0x188   :  { %v4472_v31 = vadd.f32 %v168_v28, %v163_v29  ;;  %v158_v32 = vmul.f32 %v4069_v30, %v142_v10  ;;  %v335_v30 = vld [vmem:[%s4986_s10] sm:$0xff] }
 0x18a   :  { %v171_v33 = vsel %vm131_vm0, %v4472_v31, 0.0  ;;  %v164_v34 = vmul.f32 %v162_v25, %v158_v32 }
 0x18b   :  { %172 = vadd.xlane.f32.xlu0 %v171_v33 }
 0x18c   :  { %v4476_v35 = vadd.f32 %v168_v28, %v164_v34  ;;  %v4541_v34 = vld [vmem:[#allocation6] sm:$0xff] }
 0x18e   :  { %v174_v36 = vsel %vm131_vm0, %v4476_v35, 0.0 }
 0x18f   :  { %175 = vadd.xlane.f32.xlu1 %v174_v36 }
 0x214   :  { %v173_v37 = vpop.xlane.xlu0 %172 }
 0x215   :  { %v177_v38 = vmul.f32 0.03125, %v173_v37 }
 0x217   :  { %v179_v39 = vsub.f32 %v4472_v31, %v177_v38 }
 0x218   :  { %v176_v40 = vpop.xlane.xlu1 %175 }
 0x219   :  { %v178_v41 = vmul.f32 0.03125, %v176_v40  ;;  %v181_v42 = vmul.f32 %v179_v39, %v179_v39 }
 0x21b   :  { %v180_v43 = vsub.f32 %v4476_v35, %v178_v41  ;;  %v183_v44 = vsel %vm131_vm0, %v181_v42, 0.0 }
 0x21c   :  { %184 = vadd.xlane.f32.xlu0 %v183_v44  ;;  %v3672_v44 = vld [vmem:[%s4986_s10 + $0x8] sm:$0xff] }
 0x21d   :  { %v182_v45 = vmul.f32 %v180_v43, %v180_v43 }
 0x21f   :  { %v186_v46 = vsel %vm131_vm0, %v182_v45, 0.0  ;;  %v334_v45 = vld [vmem:[%s4985_s9] sm:$0xff] }
 0x220   :  { %187 = vadd.xlane.f32.xlu1 %v186_v46 }
 0x2a5   :  { %v185_v51 = vpop.xlane.xlu0 %184 }
 0x2a6   :  { %v189_v52 = vmul.f32 0.03125, %v185_v51 }
 0x2a8   :  { %v191_v53 = vadd.f32 1e-05, %v189_v52 }
 0x2a9   :  { %v188_v54 = vpop.xlane.xlu1 %187 }
 0x2aa   :  { %4070 = vrsqrt.f32 %v191_v53  ;;  %v190_v55 = vmul.f32 0.03125, %v188_v54 }
 0x2ac   :  { %v192_v56 = vadd.f32 1e-05, %v190_v55 }
 0x2ae   :  { %4072 = vrsqrt.f32 %v192_v56 }
 0x2b7   :  { %v4071_v62 = vpop.eup %4070 }
 0x2b8   :  { %v195_v63 = vmul.f32 %v4071_v62, %v179_v39  ;;  %v4551_v39 = vld [vmem:[#allocation6 + $0x20] sm:$0xff] }
 0x2ba   :  { %v201_v2 = vmul.f32 %v200_v61, %v195_v63  ;;  %v4598_v63 = vld [vmem:[#allocation6 + $0x8] sm:$0xff] }
 0x2bb   :  { %v4073_v4 = vpop.eup %4072 }
 0x2bc   :  { %v196_v6 = vmul.f32 %v4073_v4, %v180_v43  ;;  %v207_v7 = vadd.f32 %v206_v0, %v201_v2  ;;  %v336_v4 = vld [vmem:[%s4987_s11] sm:$0xff] }
 0x2be   :  { %v202_v10 = vmul.f32 %v200_v61, %v196_v6  ;;  %3310 = vst.msk [vmem:[#allocation17 - $0x7] sm:$0x80] %vm3309_vm1, %v207_v7  ;;  %v237_v14 = vrot.slane %v207_v7, 7 }
 0x2c0   :  { %v208_v11 = vadd.f32 %v206_v0, %v202_v10  ;;  %v242_v16 = vsel %vm241_vm3, %v225_v12, %v237_v14  ;;  %v4602_v0 = vld [vmem:[#allocation6 + $0x28] sm:$0xff] }
 0x2c2   :  { %v238_v15 = vrot.slane %v208_v11, 7 }
 0x2c4   :  { %v243_v17 = vsel %vm241_vm3, %v232_v13, %v238_v15  ;;  %3312 = vst.msk [vmem:[#allocation17 + $0x1] sm:$0x1] %vm3311_vm4, %v238_v15 }
 0x2c5   :  { %v4042_v18 = vpack.i.bf16 %v243_v17, %v242_v16 }
 0x2c7   :  { %4043 = vrot.lane.b32.xlu0 %v4042_v18, %s4330_s5  ;;  %v3685_v18 = vld [vmem:[%s4986_s10 + $0x10] sm:$0xff] }
 0x339   :  { %v4044_v19 = vpop.permute.xlu0 %4043 }
 0x33a   :  { %v4046_v20 = vunpack.i.h.bf16 %v4044_v19  ;;  %v4045_v22 = vunpack.i.l.bf16 %v4044_v19  ;;  %v337_v19 = vld [vmem:[#allocation12] sm:$0xff] }
 0x33c   :  { %v253_v23 = vsel %vm131_vm0, %v208_v11, %v4046_v20  ;;  %v252_v24 = vsel %vm131_vm0, %v207_v7, %v4045_v22  ;;  %v789_v20 = vmul.f32 %v337_v19, %v4541_v34  ;;  %v790_v22 = vmul.f32 %v337_v19, %v4551_v39  ;;  %v3684_v19 = vld [vmem:[%s4985_s9 + $0x10] sm:$0xff] }
 0x33d   :  { %v254_v25 = vpack.c.bf16 %v253_v23, %v252_v24 }
 0x33f   :  { %3817 = vmatmul.mubr.msk.bf16.vlgmr.msra.gmra.mxu0 %vm287_vm5, %v254_v25 }
 0x340   :  { %3847 = vmatprep.mubr.msk.f32.mxu0 %vm4329_vm2, %v4327_v48 }
 0x3ff   :  { %v4523_v26 = vpop.f32.mrf.mxu0 }
 0x400   :  { %339 = vrot.lane.b32.xlu1 %v4523_v26, %s4331_s19 }
 0x401   :  { %v3818_v27 = vpop.f32.mrf.mxu0 }
 0x403   :  { %v4526_v28 = vpop.f32.mrf.mxu0 }
 0x404   :  { %417 = vrot.lane.b32.xlu1 %v4526_v28, %s4331_s19 }
 0x405   :  { %v3819_v29 = vpop.f32.mrf.mxu0 }
 0x408   :  { %792 = vrot.lane.b32.xlu1 %v335_v30, %s4330_s5 }
 0x472   :  { %v340_v32 = vpop.permute.xlu1 %339 }
 0x473   :  { %3821 = vmatpush3.xpose.msk.msra.mxu1 %vm341_vm6, %v340_v32  ;;  %v3671_v32 = vld [vmem:[%s4985_s9 + $0x8] sm:$0xff] }
 0x474   :  { %3825 = vmatprep.subr.mxu1 %v4327_v48 }
 0x476   :  { %3823 = vmatmul.mubr.msk.f32.vlgmr.msra.gmra.mxu1 %vm341_vm6, %v4523_v26  ;;  %v418_v33 = vpop.permute.xlu1 %417 }
 0x477   :  { %3826 = vmatpush3.xpose.msk.msra.mxu1 %vm341_vm6, %v418_v33  ;;  %3827 = vmatprep.mubr.msk.f32.mxu1 %vm4329_vm2, %v4327_v48 }
 0x478   :  { %3830 = vmatprep.subr.mxu1 %v4327_v48 }
 0x47a   :  { %3828 = vmatmul.mubr.msk.f32.vlgmr.msra.gmra.mxu1 %vm341_vm6, %v4526_v28  ;;  %v793_v36 = vpop.permute.xlu1 %792 }
 0x47b   :  { %v795_v37 = vmul.f32 %v793_v36, %v4523_v26  ;;  %v796_v38 = vmul.f32 %v793_v36, %v4526_v28  ;;  %3831 = vmatpush3.msra.mxu1 %v4541_v34  ;;  %3832 = vmatprep.mubr.msk.f32.mxu1 %vm4329_vm2, %v4327_v48 }
 0x47c   :  { %3835 = vmatprep.subr.mxu1 %v4327_v48 }
 0x47d   :  { %907 = vrot.lane.b32.xlu1 %v796_v38, %s4331_s19  ;;  %798 = vrot.lane.b32.xlu0 %v795_v37, %s4331_s19 }
 0x47e   :  { %3833 = vmatmul.mubr.msk.f32.vlgmr.msra.gmra.mxu1 %vm341_vm6, %v4523_v26 }
 0x47f   :  { %3836 = vmatpush3.msra.mxu1 %v4551_v39  ;;  %3837 = vmatprep.mubr.msk.f32.mxu1 %vm4329_vm2, %v4327_v48 }
 0x480   :  { %3840 = vmatprep.subr.mxu1 %v4327_v48 }
 0x481   :  { %713 = vrot.lane.b32.xlu1 %v4526_v28, %s4324_s1  ;;  %637 = vrot.lane.b32.xlu0 %v4523_v26, %s4324_s1 }
 0x482   :  { %3838 = vmatmul.mubr.msk.f32.vlgmr.msra.gmra.mxu1 %vm341_vm6, %v4526_v28 }
 0x483   :  { %3842 = vmatprep.mubr.msk.f32.mxu1 %vm4329_vm2, %v4327_v48 }
 0x485   :  { %1139 = vrot.lane.b32.xlu1 %v4526_v28, %s4332_s2  ;;  %1061 = vrot.lane.b32.xlu0 %v4523_v26, %s4332_s2 }
 0x489   :  { %1137 = vrot.lane.b32.xlu1 %v4526_v28, %s4333_s21  ;;  %1059 = vrot.lane.b32.xlu0 %v4523_v26, %s4333_s21 }
 0x4ef   :  { %v908_v40 = vpop.permute.xlu1 %907  ;;  %v799_v41 = vpop.permute.xlu0 %798 }
 0x4f0   :  { %910 = vxpose.xlu1.b32.start.end [1/1] (short) (narrow) %v908_v40, 8  ;;  %801 = vxpose.xlu0.b32.start.end [1/1] (short) (narrow) %v799_v41, 8 }
 0x4f3   :  { %v714_v42 = vpop.permute.xlu1 %713  ;;  %v638_v43 = vpop.permute.xlu0 %637 }
 0x4f4   :  { %3841 = vmatpush3.msra.mxu1 %v638_v43  ;;  %3846 = vmatpush3.msra.mxu0 %v714_v42 }
 0x4f5   :  { %3850 = vmatprep.subr.mxu1 %v4327_v48  ;;  %3855 = vmatprep.subr.mxu0 %v4327_v48 }
 0x4f7   :  { %v1140_v57 = vpop.permute.xlu1 %1139  ;;  %v1062_v58 = vpop.permute.xlu0 %1061 }
 0x4fb   :  { %v1138_v59 = vpop.permute.xlu1 %1137  ;;  %v1060_v60 = vpop.permute.xlu0 %1059 }
 0x519   :  { %1514 = vrot.lane.b32.xlu0 %v3672_v44, %s4334_s23 }
 0x536   :  { %v412_v46 = vpop.f32.mrf.mxu1 }
 0x537   :  { %v493_v47 = vmul.f32 %v412_v46, %v334_v45 }
 0x538   :  { %v3824_v49 = vpop.f32.mrf.mxu1 }
 0x539   :  { %3843 = vmatmul.mubr.msk.f32.vlgmr.msra.gmra.mxu1 %vm341_vm6, %v493_v47 }
 0x53a   :  { %3851 = vmatpush3.msra.mxu1 %v638_v43  ;;  %v489_v50 = vpop.f32.mrf.mxu1  ;;  %3852 = vmatprep.mubr.msk.f32.mxu1 %vm4329_vm2, %v4327_v48 }
 0x53b   :  { %v494_v51 = vmul.f32 %v489_v50, %v334_v45  ;;  %3860 = vmatprep.subr.mxu1 %v4327_v48 }
 0x53c   :  { %v3829_v52 = vpop.f32.mrf.mxu1 }
 0x53d   :  { %3848 = vmatmul.mubr.msk.f32.vlgmr.msra.gmra.mxu0 %vm341_vm6, %v494_v51  ;;  %v4676_v51 = vld [vmem:[#allocation6 + $0x10] sm:$0xff] }
 0x53e   :  { %3856 = vmatpush3.msra.mxu0 %v714_v42  ;;  %v561_v53 = vpop.f32.mrf.mxu1  ;;  %3857 = vmatprep.mubr.msk.f32.mxu0 %vm4329_vm2, %v4327_v48  ;;  %v4680_v52 = vld [vmem:[#allocation6 + $0x30] sm:$0xff] }
 0x53f   :  { %3865 = vmatprep.subr.mxu0 %v4327_v48  ;;  %v635_v5 = vmul.f32 %v561_v53, %v336_v4 }
 0x540   :  { %v3834_v54 = vpop.f32.mrf.mxu1 }
 0x542   :  { %v631_v55 = vpop.f32.mrf.mxu1 }
 0x543   :  { %v636_v10 = vmul.f32 %v631_v55, %v336_v4 }
 0x544   :  { %v3839_v56 = vpop.f32.mrf.mxu1 }
 0x56c   :  { %v926_v61 = vpop.trf.xlu1  ;;  %v817_v62 = vpop.trf.xlu0 }
 0x56d   :  { %3853 = vmatmul.mubr.msk.f32.vlgmr.msra.gmra.mxu1 %vm341_vm6, %v817_v62  ;;  %3858 = vmatmul.mubr.msk.f32.vlgmr.msra.gmra.mxu0 %vm341_vm6, %v926_v61 }
 0x56e   :  { %3861 = vmatpush3.xpose.msk.msra.mxu1 %vm341_vm6, %v1062_v58  ;;  %3866 = vmatpush3.xpose.msk.msra.mxu0 %vm341_vm6, %v1140_v57  ;;  %v3673_v57 = vld [vmem:[%s4987_s11 + $0x8] sm:$0xff] }
 0x56f   :  { %3862 = vmatprep.mubr.msk.f32.mxu1 %vm4329_vm2, %v4327_v48  ;;  %3867 = vmatprep.mubr.msk.f32.mxu0 %vm4329_vm2, %v4327_v48 }
 0x570   :  { %3870 = vmatprep.subr.mxu1 %v4327_v48  ;;  %3875 = vmatprep.subr.mxu0 %v4327_v48 }
 0x571   :  { %3863 = vmatmul.mubr.msk.f32.vlgmr.msra.gmra.mxu1 %vm341_vm6, %v1060_v60  ;;  %3868 = vmatmul.mubr.msk.f32.vlgmr.msra.gmra.mxu0 %vm341_vm6, %v1138_v59 }
 0x572   :  { %3871 = vmatpush3.msra.mxu1 %v4598_v63  ;;  %3872 = vmatprep.mubr.msk.f32.mxu1 %vm4329_vm2, %v4327_v48 }
 0x573   :  { %3876 = vmatpush3.msra.mxu0 %v4602_v0  ;;  %3877 = vmatprep.mubr.msk.f32.mxu0 %vm4329_vm2, %v4327_v48 }
 0x574   :  { %3880 = vmatprep.subr.mxu1 %v4327_v48  ;;  %3885 = vmatprep.subr.mxu0 %v4327_v48 }
 0x575   :  { %3873 = vmatmul.mubr.msk.f32.vlgmr.msra.gmra.mxu1 %vm341_vm6, %v1060_v60  ;;  %3878 = vmatmul.mubr.msk.f32.vlgmr.msra.gmra.mxu0 %vm341_vm6, %v1138_v59 }
 0x576   :  { %3882 = vmatprep.mubr.msk.f32.mxu1 %vm4329_vm2, %v4327_v48  ;;  %3887 = vmatprep.mubr.msk.f32.mxu0 %vm4329_vm2, %v4327_v48 }
 0x58b   :  { %v1515_v1 = vpop.permute.xlu0 %1514 }
 0x58c   :  { %v1517_v2 = vmul.f32 %v1515_v1, %v4523_v26  ;;  %v1518_v3 = vmul.f32 %v1515_v1, %v4526_v28 }
 0x58e   :  { %1629 = vrot.lane.b32.xlu0 %v1518_v3, %s4332_s2  ;;  %1520 = vrot.lane.b32.xlu1 %v1517_v2, %s4332_s2  ;;  %s4340_s2 = smov 104  }
 0x592   :  { %1435 = vrot.lane.b32.xlu0 %v4526_v28, %s4335_s12  ;;  %1359 = vrot.lane.b32.xlu1 %v4523_v26, %s4335_s12 }
 0x596   :  { %1870 = vrot.lane.b32.xlu0 %v4526_v28, %s4336_s28  ;;  %1792 = vrot.lane.b32.xlu1 %v4523_v26, %s4336_s28 }
 0x59a   :  { %1868 = vrot.lane.b32.xlu0 %v4526_v28, %s4337_s4  ;;  %1790 = vrot.lane.b32.xlu1 %v4523_v26, %s4337_s4 }
 0x5f9   :  { %v709_v6 = vpop.f32.mrf.mxu1 }
 0x5fa   :  { %v4637_v7 = vadd.f32 %v709_v6, %v635_v5 }
 0x5fb   :  { %v3844_v8 = vpop.f32.mrf.mxu1 }
 0x5fc   :  { %v1058_v8 = vld [vmem:[#allocation12 + $0x8] sm:$0xff] }
 0x5fd   :  { %v785_v11 = vpop.f32.mrf.mxu0 }
 0x5fe   :  { %v4639_v12 = vadd.f32 %v785_v11, %v636_v10  ;;  %v1511_v10 = vmul.f32 %v1058_v8, %v4598_v63  ;;  %v1512_v11 = vmul.f32 %v1058_v8, %v4602_v0 }
 0x5ff   :  { %v3849_v13 = vpop.f32.mrf.mxu0 }
 0x600   :  { %v1630_v14 = vpop.permute.xlu0 %1629  ;;  %v1521_v15 = vpop.permute.xlu1 %1520 }
 0x601   :  { %1632 = vxpose.xlu0.b32.start.end [1/1] (short) (narrow) %v1630_v14, 8  ;;  %1523 = vxpose.xlu1.b32.start.end [1/1] (short) (narrow) %v1521_v15, 8 }
 0x604   :  { %v1436_v16 = vpop.permute.xlu0 %1435  ;;  %v1360_v17 = vpop.permute.xlu1 %1359 }
 0x605   :  { %3881 = vmatpush3.msra.mxu1 %v1360_v17  ;;  %3886 = vmatpush3.msra.mxu0 %v1436_v16 }
 0x606   :  { %3890 = vmatprep.subr.mxu1 %v4327_v48  ;;  %3895 = vmatprep.subr.mxu0 %v4327_v48 }
 0x608   :  { %v1871_v44 = vpop.permute.xlu0 %1870  ;;  %v1793_v45 = vpop.permute.xlu1 %1792 }
 0x60c   :  { %v1869_v46 = vpop.permute.xlu0 %1868  ;;  %v1791_v47 = vpop.permute.xlu1 %1790 }
 0x62a   :  { %2245 = vrot.lane.b32.xlu0 %v3685_v18, %s4338_s18 }
 0x62d   :  { %v902_v23 = vpop.f32.mrf.mxu1  ;;  %v1011_v24 = vpop.f32.mrf.mxu0 }
 0x62e   :  { %v1015_v25 = vadd.f32 %v902_v23, %v789_v20  ;;  %v1016_v27 = vadd.f32 %v1011_v24, %v790_v22  ;;  %2090 = vrot.lane.b32.xlu0 %v4523_v26, %s4338_s18 }
 0x62f   :  { %v3854_v29 = vpop.f32.mrf.mxu1  ;;  %v3859_v30 = vpop.f32.mrf.mxu0 }
 0x630   :  { %1017 = vst.msk [vmem:[#allocation15] sm:$0xff] %vm341_vm6, %v1015_v25  ;;  %1018 = vst.msk [vmem:[#allocation15 + $0x20] sm:$0xff] %vm341_vm6, %v1016_v27 }
 0x631   :  { %v1133_v33 = vpop.f32.mrf.mxu1  ;;  %v1211_v34 = vpop.f32.mrf.mxu0 }
 0x632   :  { %v1215_v36 = vmul.f32 %v3671_v32, %v1133_v33  ;;  %v1216_v37 = vmul.f32 %v3671_v32, %v1211_v34  ;;  %2523 = vrot.lane.b32.xlu0 %v4523_v26, %s4339_s3 }
 0x633   :  { %v3864_v38 = vpop.f32.mrf.mxu1  ;;  %v3869_v39 = vpop.f32.mrf.mxu0 }
 0x634   :  { %3883 = vmatmul.mubr.msk.f32.vlgmr.msra.gmra.mxu1 %vm341_vm6, %v1215_v36  ;;  %3888 = vmatmul.mubr.msk.f32.vlgmr.msra.gmra.mxu0 %vm341_vm6, %v1216_v37 }
 0x635   :  { %3891 = vmatpush3.msra.mxu1 %v1360_v17  ;;  %3896 = vmatpush3.msra.mxu0 %v1436_v16  ;;  %v1283_v40 = vpop.f32.mrf.mxu1  ;;  %v1353_v41 = vpop.f32.mrf.mxu0 }
 0x636   :  { %2521 = vrot.lane.b32.xlu0 %v4523_v26, %s4340_s2  ;;  %3892 = vmatprep.mubr.msk.f32.mxu1 %vm4329_vm2, %v4327_v48  ;;  %v1357_v58 = vmul.f32 %v3673_v57, %v1283_v40  ;;  %v1358_v59 = vmul.f32 %v3673_v57, %v1353_v41  ;;  %v4745_v41 = vld [vmem:[#allocation6 + $0x18] sm:$0xff] }
 0x637   :  { %v3874_v42 = vpop.f32.mrf.mxu1  ;;  %v3879_v43 = vpop.f32.mrf.mxu0  ;;  %3900 = vmatprep.subr.mxu1 %v4327_v48  ;;  %3897 = vmatprep.mubr.msk.f32.mxu0 %vm4329_vm2, %v4327_v48 }
 0x638   :  { %3905 = vmatprep.subr.mxu0 %v4327_v48  ;;  %v4755_v42 = vld [vmem:[#allocation6 + $0x38] sm:$0xff] }
 0x67d   :  { %v1648_v49 = vpop.trf.xlu0  ;;  %v1539_v50 = vpop.trf.xlu1 }
 0x67e   :  { %3893 = vmatmul.mubr.msk.f32.vlgmr.msra.gmra.mxu1 %vm341_vm6, %v1539_v50  ;;  %3898 = vmatmul.mubr.msk.f32.vlgmr.msra.gmra.mxu0 %vm341_vm6, %v1648_v49 }
 0x67f   :  { %3901 = vmatpush3.xpose.msk.msra.mxu1 %vm341_vm6, %v1793_v45  ;;  %3906 = vmatpush3.xpose.msk.msra.mxu0 %vm341_vm6, %v1871_v44  ;;  %v3686_v45 = vld [vmem:[%s4987_s11 + $0x10] sm:$0xff] }
 0x680   :  { %3902 = vmatprep.mubr.msk.f32.mxu1 %vm4329_vm2, %v4327_v48  ;;  %3907 = vmatprep.mubr.msk.f32.mxu0 %vm4329_vm2, %v4327_v48 }
 0x681   :  { %3910 = vmatprep.subr.mxu1 %v4327_v48  ;;  %3915 = vmatprep.subr.mxu0 %v4327_v48 }
 0x682   :  { %3903 = vmatmul.mubr.msk.f32.vlgmr.msra.gmra.mxu1 %vm341_vm6, %v1791_v47  ;;  %3908 = vmatmul.mubr.msk.f32.vlgmr.msra.gmra.mxu0 %vm341_vm6, %v1869_v46 }
 0x683   :  { %3911 = vmatpush3.msra.mxu1 %v4676_v51  ;;  %3912 = vmatprep.mubr.msk.f32.mxu1 %vm4329_vm2, %v4327_v48 }
 0x684   :  { %3916 = vmatpush3.msra.mxu0 %v4680_v52  ;;  %3917 = vmatprep.mubr.msk.f32.mxu0 %vm4329_vm2, %v4327_v48 }
 0x685   :  { %3920 = vmatprep.subr.mxu1 %v4327_v48  ;;  %3925 = vmatprep.subr.mxu0 %v4327_v48 }
 0x686   :  { %3913 = vmatmul.mubr.msk.f32.vlgmr.msra.gmra.mxu1 %vm341_vm6, %v1791_v47  ;;  %3918 = vmatmul.mubr.msk.f32.vlgmr.msra.gmra.mxu0 %vm341_vm6, %v1869_v46 }
 0x687   :  { %3922 = vmatprep.mubr.msk.f32.mxu1 %vm4329_vm2, %v4327_v48  ;;  %3927 = vmatprep.mubr.msk.f32.mxu0 %vm4329_vm2, %v4327_v48 }
 0x69c   :  { %v2246_v53 = vpop.permute.xlu0 %2245 }
 0x69d   :  { %v2248_v54 = vmul.f32 %v2246_v53, %v4523_v26  ;;  %v2249_v56 = vmul.f32 %v2246_v53, %v4526_v28 }
 0x69f   :  { %2251 = vrot.lane.b32.xlu1 %v2248_v54, %s4336_s28 }
 0x6a0   :  { %v2091_v55 = vpop.permute.xlu0 %2090 }
 0x6a1   :  { %3921 = vmatpush3.msra.mxu1 %v2091_v55 }
 0x6a2   :  { %3930 = vmatprep.subr.mxu1 %v4327_v48 }
 0x6a3   :  { %2360 = vrot.lane.b32.xlu1 %v2249_v56, %s4336_s28 }
 0x6a4   :  { %v2524_v34 = vpop.permute.xlu0 %2523 }
 0x6a7   :  { %2166 = vrot.lane.b32.xlu1 %v4526_v28, %s4338_s18 }
 0x6a8   :  { %v2522_v37 = vpop.permute.xlu0 %2521 }
 0x6ab   :  { %2601 = vrot.lane.b32.xlu1 %v4526_v28, %s4339_s3 }
 0x6af   :  { %2599 = vrot.lane.b32.xlu1 %v4526_v28, %s4340_s2 }
 0x6f4   :  { %v1431_v60 = vpop.f32.mrf.mxu1  ;;  %v1507_v61 = vpop.f32.mrf.mxu0 }
 0x6f5   :  { %v4712_v62 = vadd.f32 %v1431_v60, %v1357_v58  ;;  %v4714_v1 = vadd.f32 %v1507_v61, %v1358_v59  ;;  %v1789_v59 = vld [vmem:[#allocation12 + $0x10] sm:$0xff] }
 0x6f6   :  { %v3884_v2 = vpop.f32.mrf.mxu1  ;;  %v3889_v3 = vpop.f32.mrf.mxu0  ;;  %v2242_v60 = vmul.f32 %v1789_v59, %v4676_v51 }
 0x6f7   :  { %v1745_v32 = vsel %vm341_vm6, %v4714_v1, 0.0  ;;  %v1742_v33 = vsel %vm341_vm6, %v4712_v62, 0.0  ;;  %v2243_v3 = vmul.f32 %v1789_v59, %v4680_v52  ;;  %v3698_v59 = vld [vmem:[%s4986_s10 + $0x18] sm:$0xff]  ;;  %s4341_s10 = smov 16  }
 0x711   :  { %v2252_v4 = vpop.permute.xlu1 %2251 }
 0x712   :  { %2254 = vxpose.xlu0.b32.start.end [1/1] (short) (narrow) %v2252_v4, 8 }
 0x715   :  { %v2361_v5 = vpop.permute.xlu1 %2360 }
 0x716   :  { %2363 = vxpose.xlu1.b32.start.end [1/1] (short) (narrow) %v2361_v5, 8  ;;  %v3697_v5 = vld [vmem:[%s4985_s9 + $0x18] sm:$0xff] }
 0x719   :  { %v2167_v6 = vpop.permute.xlu1 %2166 }
 0x71a   :  { %3926 = vmatpush3.msra.mxu0 %v2167_v6 }
 0x71b   :  { %3935 = vmatprep.subr.mxu0 %v4327_v48 }
 0x71d   :  { %v2602_v36 = vpop.permute.xlu1 %2601 }
 0x721   :  { %v2600_v38 = vpop.permute.xlu1 %2599 }
 0x734   :  { %2897 = vrot.lane.b32.xlu1 %v4526_v28, %s4334_s23 }
 0x73b   :  { %2821 = vrot.lane.b32.xlu0 %v4523_v26, %s4334_s23 }
 0x73e   :  { %v1624_v13 = vpop.f32.mrf.mxu1  ;;  %v1733_v14 = vpop.f32.mrf.mxu0 }
 0x73f   :  { %v1737_v15 = vadd.f32 %v1624_v13, %v1511_v10  ;;  %v1738_v16 = vadd.f32 %v1733_v14, %v1512_v11 }
 0x740   :  { %v3894_v17 = vpop.f32.mrf.mxu1  ;;  %v3899_v18 = vpop.f32.mrf.mxu0 }
 0x741   :  { %1740 = vst.msk [vmem:[#allocation15 + $0x8] sm:$0xff] %vm341_vm6, %v1737_v15  ;;  %1741 = vst.msk [vmem:[#allocation15 + $0x28] sm:$0xff] %vm341_vm6, %v1738_v16 }
 0x742   :  { %v1864_v20 = vpop.f32.mrf.mxu1  ;;  %v1942_v22 = vpop.f32.mrf.mxu0 }
 0x743   :  { %v1946_v23 = vmul.f32 %v3684_v19, %v1864_v20  ;;  %v1947_v63 = vmul.f32 %v3684_v19, %v1942_v22  ;;  %v3699_v22 = vld [vmem:[%s4987_s11 + $0x18] sm:$0xff] }
 0x744   :  { %v3904_v24 = vpop.f32.mrf.mxu1  ;;  %v3909_v0 = vpop.f32.mrf.mxu0 }
 0x745   :  { %3923 = vmatmul.mubr.msk.f32.vlgmr.msra.gmra.mxu1 %vm341_vm6, %v1946_v23  ;;  %3928 = vmatmul.mubr.msk.f32.vlgmr.msra.gmra.mxu0 %vm341_vm6, %v1947_v63 }
 0x746   :  { %3931 = vmatpush3.msra.mxu1 %v2091_v55  ;;  %3936 = vmatpush3.msra.mxu0 %v2167_v6  ;;  %v2014_v25 = vpop.f32.mrf.mxu1  ;;  %v2084_v27 = vpop.f32.mrf.mxu0 }
 0x747   :  { %3932 = vmatprep.mubr.msk.f32.mxu1 %vm4329_vm2, %v4327_v48  ;;  %3940 = vmatprep.subr.mxu1 %v4327_v48  ;;  %v2088_v46 = vmul.f32 %v3686_v45, %v2014_v25  ;;  %v2089_v50 = vmul.f32 %v3686_v45, %v2084_v27 }
 0x748   :  { %v3914_v29 = vpop.f32.mrf.mxu1  ;;  %v3919_v30 = vpop.f32.mrf.mxu0  ;;  %3937 = vmatprep.mubr.msk.f32.mxu0 %vm4329_vm2, %v4327_v48  ;;  %3945 = vmatprep.subr.mxu0 %v4327_v48 }
 0x758   :  { %1746 = vadd.xlane.f32.xlu1 %v1745_v32 }
 0x75a   :  { %1743 = vadd.xlane.f32.xlu0 %v1742_v33 }
 0x78e   :  { %v2270_v39 = vpop.trf.xlu0 }
 0x78f   :  { %3933 = vmatmul.mubr.msk.f32.vlgmr.msra.gmra.mxu1 %vm341_vm6, %v2270_v39 }
 0x790   :  { %3941 = vmatpush3.xpose.msk.msra.mxu1 %vm341_vm6, %v2524_v34  ;;  %3942 = vmatprep.mubr.msk.f32.mxu1 %vm4329_vm2, %v4327_v48 }
 0x791   :  { %3950 = vmatprep.subr.mxu1 %v4327_v48 }
 0x792   :  { %v2379_v40 = vpop.trf.xlu1 }
 0x793   :  { %3938 = vmatmul.mubr.msk.f32.vlgmr.msra.gmra.mxu0 %vm341_vm6, %v2379_v40  ;;  %3943 = vmatmul.mubr.msk.f32.vlgmr.msra.gmra.mxu1 %vm341_vm6, %v2522_v37 }
 0x794   :  { %3946 = vmatpush3.xpose.msk.msra.mxu0 %vm341_vm6, %v2602_v36  ;;  %3947 = vmatprep.mubr.msk.f32.mxu0 %vm4329_vm2, %v4327_v48 }
 0x795   :  { %3951 = vmatpush3.msra.mxu1 %v4745_v41  ;;  %3952 = vmatprep.mubr.msk.f32.mxu1 %vm4329_vm2, %v4327_v48 }
 0x796   :  { %3955 = vmatprep.subr.mxu0 %v4327_v48  ;;  %3960 = vmatprep.subr.mxu1 %v4327_v48 }
 0x797   :  { %3948 = vmatmul.mubr.msk.f32.vlgmr.msra.gmra.mxu0 %vm341_vm6, %v2600_v38  ;;  %3953 = vmatmul.mubr.msk.f32.vlgmr.msra.gmra.mxu1 %vm341_vm6, %v2522_v37 }
 0x798   :  { %3956 = vmatpush3.msra.mxu0 %v4755_v42  ;;  %3957 = vmatprep.mubr.msk.f32.mxu0 %vm4329_vm2, %v4327_v48 }
 0x799   :  { %3965 = vmatprep.subr.mxu0 %v4327_v48  ;;  %3962 = vmatprep.mubr.msk.f32.mxu1 %vm4329_vm2, %v4327_v48 }
 0x79b   :  { %3958 = vmatmul.mubr.msk.f32.vlgmr.msra.gmra.mxu0 %vm341_vm6, %v2600_v38 }
 0x79c   :  { %3967 = vmatprep.mubr.msk.f32.mxu0 %vm4329_vm2, %v4327_v48 }
 0x7a6   :  { %v2898_v43 = vpop.permute.xlu1 %2897 }
 0x7a7   :  { %3966 = vmatpush3.msra.mxu0 %v2898_v43 }
 0x7a8   :  { %3975 = vmatprep.subr.mxu0 %v4327_v48 }
 0x7ad   :  { %v2822_v44 = vpop.permute.xlu0 %2821 }
 0x7ae   :  { %3961 = vmatpush3.msra.mxu1 %v2822_v44 }
 0x7af   :  { %3970 = vmatprep.subr.mxu1 %v4327_v48 }
 0x7e1   :  { %v1747_v63 = vpop.xlane.xlu1 %1746 }
 0x7e2   :  { %v1749_v29 = vmul.f32 0.125, %v1747_v63 }
 0x7e3   :  { %v1744_v20 = vpop.xlane.xlu0 %1743 }
 0x7e4   :  { %v1748_v24 = vmul.f32 0.125, %v1744_v20  ;;  %v4803_v40 = vsub.f32 %v4714_v1, %v1749_v29 }
 0x7e6   :  { %v4799_v32 = vsub.f32 %v4712_v62, %v1748_v24 }
 0x805   :  { %v2162_v47 = vpop.f32.mrf.mxu1  ;;  %v2238_v49 = vpop.f32.mrf.mxu0 }
 0x806   :  { %v2163_v53 = vadd.f32 %v2162_v47, %v2088_v46  ;;  %v4775_v56 = vadd.f32 %v2238_v49, %v2089_v50  ;;  %v1752_v47 = vmul.f32 %v4799_v32, %v4799_v32  ;;  %v1022_v49 = vsel %vm341_vm6, %v4639_v12, 0.0 }
 0x807   :  { %v3924_v54 = vpop.f32.mrf.mxu1  ;;  %v3929_v55 = vpop.f32.mrf.mxu0 }
 0x808   :  { %v2473_v57 = vsel %vm341_vm6, %v2163_v53, 0.0  ;;  %v2476_v58 = vsel %vm341_vm6, %v4775_v56, 0.0  ;;  %v1754_v50 = vsel %vm341_vm6, %v1752_v47, 0.0  ;;  %v1753_v54 = vmul.f32 %v4803_v40, %v4803_v40 }
 0x809   :  { %2474 = vadd.xlane.f32.xlu0 %v2473_v57 }
 0x80a   :  { %v1757_v57 = vsel %vm341_vm6, %v1753_v54, 0.0 }
 0x80d   :  { %2477 = vadd.xlane.f32.xlu0 %v2476_v58 }
 0x84f   :  { %v2355_v61 = vpop.f32.mrf.mxu1 }
 0x850   :  { %v2468_v2 = vadd.f32 %v2355_v61, %v2242_v60 }
 0x851   :  { %v3934_v4 = vpop.f32.mrf.mxu1 }
 0x852   :  { %2471 = vst.msk [vmem:[#allocation15 + $0x10] sm:$0xff] %vm341_vm6, %v2468_v2 }
 0x853   :  { %v2464_v6 = vpop.f32.mrf.mxu0  ;;  %v2595_v8 = vpop.f32.mrf.mxu1 }
 0x854   :  { %v2469_v10 = vadd.f32 %v2464_v6, %v2243_v3  ;;  %v2677_v11 = vmul.f32 %v3697_v5, %v2595_v8 }
 0x855   :  { %v3939_v13 = vpop.f32.mrf.mxu0  ;;  %v3944_v14 = vpop.f32.mrf.mxu1 }
 0x856   :  { %2472 = vst.msk [vmem:[#allocation15 + $0x30] sm:$0xff] %vm341_vm6, %v2469_v10  ;;  %3963 = vmatmul.mubr.msk.f32.vlgmr.msra.gmra.mxu1 %vm341_vm6, %v2677_v11 }
 0x857   :  { %3971 = vmatpush3.msra.mxu1 %v2822_v44  ;;  %v2673_v51 = vpop.f32.mrf.mxu0  ;;  %v2745_v52 = vpop.f32.mrf.mxu1  ;;  %3972 = vmatprep.mubr.msk.f32.mxu1 %vm4329_vm2, %v4327_v48  ;;  %v1019_v44 = vsel %vm341_vm6, %v4637_v7, 0.0 }
 0x858   :  { %v2678_v15 = vmul.f32 %v3697_v5, %v2673_v51  ;;  %3980 = vmatprep.subr.bf16.mxu1 %v4327_v48  ;;  %v2819_v0 = vmul.f32 %v3699_v22, %v2745_v52 }
 0x859   :  { %v3949_v16 = vpop.f32.mrf.mxu0  ;;  %v3954_v17 = vpop.f32.mrf.mxu1 }
 0x85a   :  { %3968 = vmatmul.mubr.msk.f32.vlgmr.msra.gmra.mxu0 %vm341_vm6, %v2678_v15 }
 0x85b   :  { %3976 = vmatpush3.msra.mxu0 %v2898_v43  ;;  %v2815_v18 = vpop.f32.mrf.mxu0  ;;  %3977 = vmatprep.mubr.msk.f32.mxu0 %vm4329_vm2, %v4327_v48 }
 0x85c   :  { %3988 = vmatprep.subr.bf16.mxu0 %v4327_v48  ;;  %v2820_v33 = vmul.f32 %v3699_v22, %v2815_v18 }
 0x85d   :  { %v3959_v19 = vpop.f32.mrf.mxu0 }
 0x892   :  { %v2475_v23 = vpop.xlane.xlu0 %2474 }
 0x893   :  { %v2479_v34 = vmul.f32 0.125, %v2475_v23 }
 0x895   :  { %v4807_v45 = vsub.f32 %v2163_v53, %v2479_v34 }
 0x896   :  { %v2478_v37 = vpop.xlane.xlu0 %2477 }
 0x897   :  { %v2480_v46 = vmul.f32 0.125, %v2478_v37  ;;  %v2483_v53 = vmul.f32 %v4807_v45, %v4807_v45 }
 0x899   :  { %v4815_v1 = vsub.f32 %v4775_v56, %v2480_v46  ;;  %v2485_v55 = vsel %vm341_vm6, %v2483_v53, 0.0 }
 0x89b   :  { %v2484_v58 = vmul.f32 %v4815_v1, %v4815_v1 }
 0x89d   :  { %v2488_v56 = vsel %vm341_vm6, %v2484_v58, 0.0 }
 0x916   :  { %v2893_v25 = vpop.f32.mrf.mxu1 }
 0x917   :  { %v2894_v27 = vadd.f32 %v2893_v25, %v2819_v0 }
 0x918   :  { %v3964_v30 = vpop.f32.mrf.mxu1 }
 0x919   :  { %v3204_v36 = vsel %vm341_vm6, %v2894_v27, 0.0 }
 0x91a   :  { %3205 = vadd.xlane.f32.xlu0 %v3204_v36  ;;  %v2969_v38 = vpop.f32.mrf.mxu0 }
 0x91b   :  { %v2970_v39 = vadd.f32 %v2969_v38, %v2820_v33 }
 0x91c   :  { %v3969_v43 = vpop.f32.mrf.mxu0 }
 0x91d   :  { %v3207_v62 = vsel %vm341_vm6, %v2970_v39, 0.0 }
 0x91e   :  { %1020 = vadd.xlane.f32.xlu0 %v1019_v44  ;;  %3208 = vadd.xlane.f32.xlu1 %v3207_v62 }
 0x922   :  { %1755 = vadd.xlane.f32.xlu0 %v1754_v50  ;;  %1023 = vadd.xlane.f32.xlu1 %v1022_v49 }
 0x926   :  { %2486 = vadd.xlane.f32.xlu0 %v2485_v55  ;;  %1758 = vadd.xlane.f32.xlu1 %v1757_v57 }
 0x92a   :  { %2489 = vadd.xlane.f32.xlu1 %v2488_v56 }
 0x93c   :  { %2976 = vrot.lane.b32.xlu0 %v3698_v59, %s4335_s12  ;;  %s4342_s12 = smov 24  }
 0x9a3   :  { %v3206_v60 = vpop.xlane.xlu0 %3205 }
 0x9a4   :  { %v3210_v61 = vmul.f32 0.125, %v3206_v60 }
 0x9a6   :  { %v4831_v2 = vsub.f32 %v2894_v27, %v3210_v61 }
 0x9a7   :  { %v1021_v3 = vpop.xlane.xlu0 %1020  ;;  %v3209_v4 = vpop.xlane.xlu1 %3208 }
 0x9a8   :  { %v1026_v5 = vmul.f32 0.125, %v1021_v3  ;;  %v3211_v6 = vmul.f32 0.125, %v3209_v4  ;;  %v3214_v8 = vmul.f32 %v4831_v2, %v4831_v2 }
 0x9aa   :  { %v4836_v10 = vsub.f32 %v4637_v7, %v1026_v5  ;;  %v4838_v11 = vsub.f32 %v2970_v39, %v3211_v6  ;;  %v3216_v13 = vsel %vm341_vm6, %v3214_v8, 0.0 }
 0x9ab   :  { %v1756_v14 = vpop.xlane.xlu0 %1755  ;;  %3217 = vadd.xlane.f32.xlu1 %v3216_v13  ;;  %v1024_v51 = vpop.xlane.xlu1 %1023 }
 0x9ac   :  { %v1760_v52 = vmul.f32 0.125, %v1756_v14  ;;  %v1027_v15 = vmul.f32 0.125, %v1024_v51  ;;  %v3215_v16 = vmul.f32 %v4838_v11, %v4838_v11  ;;  %v1030_v7 = vmul.f32 %v4836_v10, %v4836_v10 }
 0x9ae   :  { %v1762_v17 = vadd.f32 1e-05, %v1760_v52  ;;  %v4844_v18 = vsub.f32 %v4639_v12, %v1027_v15  ;;  %v3219_v19 = vsel %vm341_vm6, %v3215_v16, 0.0  ;;  %v1032_v0 = vsel %vm341_vm6, %v1030_v7, 0.0  ;;  %v4056_v52 = vld [vmem:[#allocation11 + $0x8] sm:$0xff]   ;;  %v4057_v16 = vld [vmem:[#allocation11] sm:$0xff]  }
 0x9af   :  { %v2487_v20 = vpop.xlane.xlu0 %2486  ;;  %3220 = vadd.xlane.f32.xlu1 %v3219_v19  ;;  %v1759_v22 = vpop.xlane.xlu1 %1758  ;;  %v4878_v7 = vld [vmem:[#allocation12 + $0x18] sm:$0xff] }
 0x9b0   :  { %4074 = vrsqrt.f32 %v1762_v17  ;;  %v2491_v23 = vmul.f32 0.125, %v2487_v20  ;;  %v1761_v63 = vmul.f32 0.125, %v1759_v22  ;;  %v1031_v25 = vmul.f32 %v4844_v18, %v4844_v18 }
 0x9b1   :  { %v2973_v20 = vmul.f32 %v4878_v7, %v4745_v41 }
 0x9b2   :  { %v1763_v24 = vadd.f32 1e-05, %v1761_v63  ;;  %v2493_v27 = vadd.f32 1e-05, %v2491_v23  ;;  %v1035_v33 = vsel %vm341_vm6, %v1031_v25, 0.0  ;;  %v3250_v63 = vsub.s32 6, %v4468_v21 }
 0x9b3   :  { %1033 = vadd.xlane.f32.xlu1 %v1032_v0  ;;  %v2490_v12 = vpop.xlane.xlu1 %2489  ;;  %v4855_v38 = vpop.permute.xlu0 %2976  ;;  %v4102_v0 = vld [vmem:[#allocation9] sm:$0xff] }
 0x9b4   :  { %v2492_v29 = vmul.f32 0.125, %v2490_v12  ;;  %4076 = vrsqrt.f32 %v1763_v24  ;;  %v2979_v44 = vmul.f32 %v4855_v38, %v4523_v26  ;;  %v3251_v25 = vrot.slane %v4102_v0, %v3250_v63 }
 0x9b5   :  { %4078 = vrsqrt.f32 %v2493_v27 }
 0x9b6   :  { %v2494_v30 = vadd.f32 1e-05, %v2492_v29 }
 0x9b7   :  { %1036 = vadd.xlane.f32.xlu1 %v1035_v33 }
 0x9b8   :  { %4080 = vrsqrt.f32 %v2494_v30 }
 0x9bd   :  { %v4075_v34 = vpop.eup %4074 }
 0x9be   :  { %v1766_v36 = vmul.f32 %v4075_v34, %v4799_v32 }
 0x9c0   :  { %1770 = vrot.lane.b32.xlu0 %v1766_v36, %s4319_s25 }
 0x9c1   :  { %v4077_v37 = vpop.eup %4076 }
 0x9c2   :  { %v1767_v39 = vmul.f32 %v4077_v37, %v4803_v40  ;;  %v4079_v43 = vpop.eup %4078 }
 0x9c3   :  { %v2497_v62 = vmul.f32 %v4079_v43, %v4807_v45 }
 0x9c4   :  { %1772 = vrot.lane.b32.xlu0 %v1767_v39, %s4319_s25 }
 0x9c5   :  { %v4081_v46 = vpop.eup %4080 }
 0x9c6   :  { %v2498_v32 = vmul.f32 %v4081_v46, %v4815_v1 }
 0x9c8   :  { %2982 = vrot.lane.b32.xlu1 %v2979_v44, %s4339_s3  ;;  %2501 = vrot.lane.b32.xlu0 %v2497_v62, %s4341_s10 }
 0x9cc   :  { %2503 = vrot.lane.b32.xlu1 %v2498_v32, %s4341_s10 }
 0xa32   :  { %v1771_v60 = vpop.permute.xlu0 %1770 }
 0xa34   :  { %v3218_v47 = vpop.xlane.xlu1 %3217 }
 0xa35   :  { %v3222_v49 = vmul.f32 0.125, %v3218_v47 }
 0xa36   :  { %v1773_v4 = vpop.permute.xlu0 %1772 }
 0xa37   :  { %v3224_v50 = vadd.f32 1e-05, %v3222_v49 }
 0xa38   :  { %v3221_v40 = vpop.xlane.xlu1 %3220 }
 0xa39   :  { %4082 = vrsqrt.f32 %v3224_v50  ;;  %v3223_v53 = vmul.f32 0.125, %v3221_v40  ;;  %v2980_v40 = vmul.f32 %v4855_v38, %v4526_v28  ;;  %v3713_v38 = vld.sshfl [vmem:[#allocation8] sm:$0x11 pattern:$0x75316420] }
 0xa3a   :  { %v2502_v14 = vpop.permute.xlu0 %2501 }
 0xa3b   :  { %v3225_v54 = vadd.f32 1e-05, %v3223_v53 }
 0xa3c   :  { %v1034_v55 = vpop.xlane.xlu1 %1033 }
 0xa3d   :  { %4084 = vrsqrt.f32 %v3225_v54  ;;  %v1038_v26 = vmul.f32 0.125, %v1034_v55 }
 0xa3f   :  { %v1040_v57 = vadd.f32 1e-05, %v1038_v26 }
 0xa40   :  { %v1037_v58 = vpop.xlane.xlu1 %1036 }
 0xa41   :  { %4086 = vrsqrt.f32 %v1040_v57  ;;  %v1039_v45 = vmul.f32 0.125, %v1037_v58 }
 0xa43   :  { %v1041_v56 = vadd.f32 1e-05, %v1039_v45  ;;  %v3343_v45 = vsub.s32 4, %v4468_v21 }
 0xa44   :  { %v2983_v8 = vpop.permute.xlu1 %2982 }
 0xa45   :  { %4088 = vrsqrt.f32 %v1041_v56  ;;  %v3349_v56 = vsub.s32 5, %v4468_v21 }
 0xa46   :  { %v4083_v59 = vpop.eup %4082 }
 0xa47   :  { %v3228_v1 = vmul.f32 %v4083_v59, %v4831_v2  ;;  %v3344_v59 = vrot.slane %v4102_v0, %v3343_v45 }
 0xa49   :  { %3232 = vrot.lane.b32.xlu0 %v3228_v1, %s4342_s12 }
 0xa4a   :  { %v4085_v61 = vpop.eup %4084 }
 0xa4b   :  { %v3229_v3 = vmul.f32 %v4085_v61, %v4838_v11  ;;  %v2504_v11 = vpop.permute.xlu1 %2503  ;;  %v3350_v61 = vrot.slane %v4102_v0, %v3349_v56 }
 0xa4d   :  { %3234 = vrot.lane.b32.xlu1 %v3229_v3, %s4342_s12 }
 0xa4e   :  { %v4087_v5 = vpop.eup %4086 }
 0xa4f   :  { %v1044_v6 = vmul.f32 %v4087_v5, %v4836_v10 }
 0xa51   :  { %1046 = vst.msk [vmem:[#allocation2] sm:$0xff] %vm341_vm6, %v1044_v6  ;;  %v3362_v6 = vcombine.high %v3713_v38, %v3713_v38 }
 0xa52   :  { %v4089_v13 = vpop.eup %4088  ;;  %1777 = vst.msk [vmem:[#allocation2] sm:$0xff] %vm1776_vm7, %v1771_v60 }
 0xa53   :  { %v1045_v2 = vmul.f32 %v4089_v13, %v4844_v18  ;;  %2508 = vst.msk [vmem:[#allocation2] sm:$0xff] %vm2507_vm8, %v2502_v14  ;;  %v3369_v14 = vrot.slane %v3713_v38, %v4504_v9 }
 0xa55   :  { %1047 = vst.msk [vmem:[#allocation2 + $0x8] sm:$0xff] %vm341_vm6, %v1045_v2  ;;  %v3376_v2 = vrot.slane %v3362_v6, %v4504_v9  ;;  %v4059_v9 = vld [vmem:[%s4983_s7 + $0x10] sm:$0xff]  }
 0xa56   :  { %1778 = vst.msk [vmem:[#allocation2 + $0x8] sm:$0xff] %vm1776_vm7, %v1773_v4 }
 0xa57   :  { %2509 = vst.msk [vmem:[#allocation2 + $0x8] sm:$0xff] %vm2507_vm8, %v2504_v11 }
 0xa67   :  { %2985 = vxpose.xlu0.b32.start.end [1/1] (short) (narrow) %v2983_v8, 8 }
 0xabb   :  { %v3233_v51 = vpop.permute.xlu0 %3232 }
 0xabc   :  { %3239 = vst.msk [vmem:[#allocation2] sm:$0xff] %vm3238_vm9, %v3233_v51 }
 0xabf   :  { %v3235_v10 = vpop.permute.xlu1 %3234 }
 0xac0   :  { %3240 = vst.msk [vmem:[#allocation2 + $0x8] sm:$0xff] %vm3238_vm9, %v3235_v10 }
 0xac3   :  { %v3241_v18 = vld [vmem:[#allocation2] sm:$0xff] }
 0xac7   :  { %v3242_v17 = vld [vmem:[#allocation2 + $0x8] sm:$0xff] }
 0xac8   :  { %v3243_v19 = vpack.c.bf16 %v3242_v17, %v3241_v18  ;;  %v4058_v17 = vld [vmem:[%s4983_s7 + $0x18] sm:$0xff]  }
 0xae3   :  { %v3001_v15 = vpop.trf.xlu0 }
 0xae4   :  { %3973 = vmatmul.mubr.msk.f32.vlgmr.msra.gmra.mxu1 %vm341_vm6, %v3001_v15 }
 0xae5   :  { %3981 = vmatpush3.bf16.msra.mxu1 %v4056_v52  ;;  %3984 = vmatprep.mubr.msk.bf16.mxu1 %vm4329_vm2, %v4327_v48 }
 0xae6   :  { %3982 = vmatprep.subr.bf16.mxu1 %v4327_v48 }
 0xae9   :  { %3983 = vmatpush3.bf16.msra.mxu1 %v4057_v16 }
 0xaea   :  { %4000 = vmatprep.subr.bf16.mxu1 %v4327_v48 }
 0xaec   :  { %3985 = vmatmul.mubr.msk.bf16.vlgmr.msra.gmra.mxu1 %vm131_vm0, %v3243_v19  ;;  %v4060_v19 = vld [vmem:[%s4983_s7 + $0x8] sm:$0xff]  }
 0xaed   :  { %4008 = vmatprep.mubr.msk.bf16.mxu1 %vm4329_vm2, %v4327_v48 }
 0xba4   :  { %v3086_v22 = vpop.f32.mrf.mxu1 }
 0xba5   :  { %v3199_v23 = vadd.f32 %v3086_v22, %v2973_v20 }
 0xba6   :  { %v3974_v24 = vpop.f32.mrf.mxu1 }
 0xba7   :  { %3202 = vst.msk [vmem:[#allocation15 + $0x18] sm:$0xff] %vm341_vm6, %v3199_v23  ;;  %v4061_v23 = vld [vmem:[%s4983_s7] sm:$0xff]  }
 0xbac   :  { %v3301_v27 = vpop.f32.mrf.mxu1 }
 0xbad   :  { %v3302_v12 = vadd.f32 %v3301_v27, %v3251_v25  ;;  %v4063_v27 = vld [vmem:[%s4984_s8 + $0x10] sm:$0xff]  }
 0xbae   :  { %v3986_v29 = vpop.f32.mrf.mxu1 }
 0xbaf   :  { %v4885_v30 = vadd.f32 %v3302_v12, %v4472_v31  ;;  %v4064_v12 = vld [vmem:[%s4984_s8 + $0x8] sm:$0xff]   ;;  %v4065_v29 = vld [vmem:[%s4984_s8] sm:$0xff]  }
 0xbb0   :  { %v3304_v33 = vpop.f32.mrf.mxu1 }
 0xbb1   :  { %v3305_v34 = vadd.f32 %v3304_v33, %v3251_v25  ;;  %v3315_v41 = vsel %vm131_vm0, %v4885_v30, 0.0  ;;  %v4062_v25 = vld [vmem:[%s4984_s8 + $0x18] sm:$0xff]   ;;  %v2974_v33 = vmul.f32 %v4878_v7, %v4755_v42  ;;  %s4343_s8 = smov [#allocation15]  }
 0xbb2   :  { %3316 = vadd.xlane.f32.xlu1 %v3315_v41  ;;  %v3987_v36 = vpop.f32.mrf.mxu1  ;;  %4001 = vmatpush3.bf16.msra.mxu1 %v4062_v25  ;;  %s3609_s4 = sshll.u32 %s4343_s8, 4  ;;  %s3610_s4 = int_to_ptr.vmem [resolvable:$true] %s3609_s4 }
 0xbb3   :  { %v4890_v37 = vadd.f32 %v3305_v34, %v4476_v35  ;;  %4002 = vmatprep.subr.bf16.mxu1 %v4327_v48  ;;  %s4223_s9 = scalar_lea.vmem %s3610_s4, 1024  ;;  %p4228_p3 = scmp.lt.s32.totalorder %s3610_s4, %s3610_s4 }
 0xbb4   :  { %p4224_p2 = scmp.ne.s32.totalorder %s3610_s4, %s4223_s9  ;;  %p4229_p4 = scmp.lt.s32.totalorder %s4223_s9, %s4223_s9 }
 0xbb5   :  { %v3318_v39 = vsel %vm131_vm0, %v4890_v37, 0.0 }
 0xbb6   :  { %3319 = vadd.xlane.f32.xlu0 %v3318_v39  ;;  %4003 = vmatpush3.bf16.msra.mxu1 %v4063_v27  ;;  %p4230_p5 = por %p4229_p4, %p4228_p3 }
 0xbb7   :  { %4004 = vmatprep.subr.bf16.mxu1 %v4327_v48 }
 0xbb8   :  { %p4231_p6 = pnand %p4230_p5, %p4224_p2 }
 0xbba   :  { %4005 = vmatpush3.bf16.msra.mxu1 %v4064_v12 }
 0xbbb   :  { %4006 = vmatprep.subr.bf16.mxu1 %v4327_v48 }
 0xbbe   :  { %4007 = vmatpush3.bf16.msra.mxu1 %v4065_v29 }
 0xc3b   :  { %v3317_v43 = vpop.xlane.xlu1 %3316 }
 0xc3c   :  { %v3321_v44 = vmul.f32 0.03125, %v3317_v43 }
 0xc3e   :  { %v3323_v46 = vsub.f32 %v4885_v30, %v3321_v44 }
 0xc3f   :  { %v3320_v31 = vpop.xlane.xlu0 %3319 }
 0xc40   :  { %v3322_v62 = vmul.f32 0.03125, %v3320_v31  ;;  %v3325_v32 = vmul.f32 %v3323_v46, %v3323_v46 }
 0xc42   :  { %v3324_v47 = vsub.f32 %v4890_v37, %v3322_v62  ;;  %v3327_v49 = vsel %vm131_vm0, %v3325_v32, 0.0 }
 0xc43   :  { %3328 = vadd.xlane.f32.xlu1 %v3327_v49 }
 0xc44   :  { %v3326_v50 = vmul.f32 %v3324_v47, %v3324_v47 }
 0xc46   :  { %v3330_v35 = vsel %vm131_vm0, %v3326_v50, 0.0 }
 0xc47   :  { %3331 = vadd.xlane.f32.xlu1 %v3330_v35 }
 0xc58   :  { %3091 = vrot.lane.b32.xlu1 %v2980_v40, %s4339_s3 }
 0xccc   :  { %v3329_v53 = vpop.xlane.xlu1 %3328 }
 0xccd   :  { %v3333_v54 = vmul.f32 0.03125, %v3329_v53 }
 0xccf   :  { %v3335_v55 = vadd.f32 1e-05, %v3333_v54 }
 0xcd0   :  { %v3332_v26 = vpop.xlane.xlu1 %3331 }
 0xcd1   :  { %4090 = vrsqrt.f32 %v3335_v55  ;;  %v3334_v57 = vmul.f32 0.03125, %v3332_v26 }
 0xcd3   :  { %v3336_v58 = vadd.f32 1e-05, %v3334_v57 }
 0xcd4   :  { %v3092_v15 = vpop.permute.xlu1 %3091 }
 0xcd5   :  { %4092 = vrsqrt.f32 %v3336_v58 }
 0xcde   :  { %v4091_v60 = vpop.eup %4090 }
 0xcdf   :  { %v3339_v1 = vmul.f32 %v4091_v60, %v3323_v46 }
 0xce1   :  { %v3345_v3 = vmul.f32 %v3344_v59, %v3339_v1 }
 0xce2   :  { %v4093_v28 = vpop.eup %4092 }
 0xce3   :  { %v3340_v4 = vmul.f32 %v4093_v28, %v3324_v47  ;;  %v3351_v5 = vadd.f32 %v3350_v61, %v3345_v3 }
 0xce5   :  { %v3346_v8 = vmul.f32 %v3344_v59, %v3340_v4  ;;  %3578 = vst.msk [vmem:[#allocation18 - $0x7] sm:$0x80] %vm3309_vm1, %v3351_v5  ;;  %v3381_v11 = vrot.slane %v3351_v5, 7 }
 0xce7   :  { %v3352_v13 = vadd.f32 %v3350_v61, %v3346_v8  ;;  %v3385_v51 = vsel %vm241_vm3, %v3369_v14, %v3381_v11 }
 0xce9   :  { %v3382_v21 = vrot.slane %v3352_v13, 7 }
 0xceb   :  { %v3386_v10 = vsel %vm241_vm3, %v3376_v2, %v3382_v21  ;;  %3579 = vst.msk [vmem:[#allocation18 + $0x1] sm:$0x1] %vm3311_vm4, %v3382_v21 }
 0xcec   :  { %v4047_v52 = vpack.i.bf16 %v3386_v10, %v3385_v51 }
 0xcee   :  { %4048 = vrot.lane.b32.xlu1 %v4047_v52, %s4330_s5 }
 0xd17   :  { %3094 = vxpose.xlu1.b32.start.end [1/1] (short) (narrow) %v3092_v15, 8 }
 0xd60   :  { %v4049_v16 = vpop.permute.xlu1 %4048 }
 0xd61   :  { %v4051_v20 = vunpack.i.h.bf16 %v4049_v16  ;;  %v4050_v22 = vunpack.i.l.bf16 %v4049_v16 }
 0xd63   :  { %v3396_v63 = vsel %vm131_vm0, %v3352_v13, %v4051_v20  ;;  %v3395_v24 = vsel %vm131_vm0, %v3351_v5, %v4050_v22 }
 0xd64   :  { %v3397_v0 = vpack.c.bf16 %v3396_v63, %v3395_v24 }
 0xd93   :  { %v3110_v18 = vpop.trf.xlu1 }
 0xd94   :  { %3978 = vmatmul.mubr.msk.f32.vlgmr.msra.gmra.mxu0 %vm341_vm6, %v3110_v18 }
 0xd95   :  { %3989 = vmatpush3.bf16.msra.mxu0 %v4058_v17  ;;  %3996 = vmatprep.mubr.msk.bf16.mxu0 %vm4329_vm2, %v4327_v48 }
 0xd96   :  { %3990 = vmatprep.subr.bf16.mxu0 %v4327_v48 }
 0xd99   :  { %3991 = vmatpush3.bf16.msra.mxu0 %v4059_v9 }
 0xd9a   :  { %3992 = vmatprep.subr.bf16.mxu0 %v4327_v48 }
 0xd9d   :  { %3993 = vmatpush3.bf16.msra.mxu0 %v4060_v19 }
 0xd9e   :  { %3994 = vmatprep.subr.bf16.mxu0 %v4327_v48 }
 0xda1   :  { %3995 = vmatpush3.bf16.msra.mxu0 %v4061_v23 }
 0xda4   :  { %3997 = vmatmul.mubr.msk.bf16.vlgmr.msra.gmra.mxu0 %vm287_vm5, %v3397_v0 }
 0xe54   :  { %v3195_v34 = vpop.f32.mrf.mxu0 }
 0xe55   :  { %v3200_v41 = vadd.f32 %v3195_v34, %v2974_v33 }
 0xe56   :  { %v3979_v36 = vpop.f32.mrf.mxu0 }
 0xe57   :  { %3203 = vst.msk [vmem:[#allocation15 + $0x38] sm:$0xff] %vm341_vm6, %v3200_v41 }
 0xe64   :  { %v3467_v39 = vpop.f32.mrf.mxu0 }
 0xe65   :  { %v3474_v44 = vmax.f32 %v3467_v39, 0.0  ;;  %v3724_v35 = vmul.f32 -1.442695, %v3467_v39 }
 0xe66   :  { %v3998_v43 = vpop.f32.mrf.mxu0 }
 0xe67   :  { %v3476_v48 = vmul.f32 %v3474_v44, %v3474_v44  ;;  %4094 = vpow2.f32 %v3724_v35 }
 0xe68   :  { %v3470_v46 = vpop.f32.mrf.mxu0 }
 0xe69   :  { %v3475_v31 = vmax.f32 %v3470_v46, 0.0  ;;  %v3725_v40 = vmul.f32 -1.442695, %v3470_v46 }
 0xe6a   :  { %v3999_v62 = vpop.f32.mrf.mxu0 }
 0xe6b   :  { %v3477_v32 = vmul.f32 %v3475_v31, %v3475_v31  ;;  %4096 = vpow2.f32 %v3725_v40 }
 0xe6d   :  { %v3478_v47 = vpack.c.bf16 %v3477_v32, %v3476_v48 }
 0xe6f   :  { %4009 = vmatmul.mubr.msk.bf16.vlgmr.msra.gmra.mxu1 %vm287_vm5, %v3478_v47 }
 0xe74   :  { %v4095_v53 = vpop.eup %4094 }
 0xe75   :  { %v3561_v54 = vadd.f32 1.0, %v4095_v53 }
 0xe77   :  { %4098 = vrcp.f32 %v3561_v54 }
 0xe78   :  { %v4097_v55 = vpop.eup %4096 }
 0xe79   :  { %v3562_v26 = vadd.f32 1.0, %v4097_v55 }
 0xe7b   :  { %4100 = vrcp.f32 %v3562_v26 }
 0xf2f   :  { %v3548_v49 = vpop.f32.mrf.mxu1 }
 0xf30   :  { %3569 = vrot.lane.b32.xlu0 %v3548_v49, %s4324_s1 }
 0xf31   :  { %v4010_v42 = vpop.f32.mrf.mxu1 }
 0xf33   :  { %v3551_v7 = vpop.f32.mrf.mxu1 }
 0xf34   :  { %3571 = vrot.lane.b32.xlu0 %v3551_v7, %s4324_s1 }
 0xf35   :  { %v4011_v50 = vpop.f32.mrf.mxu1 }
 0xf36   :  { %4234 = shalt.err (!%p4231_p6)
}
 0xf37   :  { %3615 = dma.vmem_to_hbm [thread:$0]  %s3610_s4, 1024, %s4990_s14, [#allocation16], %s4318_s24, %s4318_s24, %s4319_s25   ;;  %v4099_v57 = vpop.eup %4098 }
 0xf38   :  { %s4344_s30 = smov [#allocation17]   ;;  %s4345_s12 = smov [#allocation18]  }
 0xf39   :  { %s3622_s10 = sshll.u32 %s4344_s30, 4  ;;  %s3632_s0 = sshll.u32 %s4345_s12, 4  ;;  %s3623_s10 = int_to_ptr.vmem [resolvable:$true] %s3622_s10  ;;  %s3633_s0 = int_to_ptr.vmem [resolvable:$true] %s3632_s0 }
 0xf3a   :  { %s4243_s17 = scalar_lea.vmem %s3623_s10, 32  ;;  %p4248_p8 = scmp.lt.s32.totalorder %s3623_s10, %s3623_s10 }
 0xf3b   :  { %p4244_p7 = scmp.ne.s32.totalorder %s3623_s10, %s4243_s17  ;;  %p4249_p9 = scmp.lt.s32.totalorder %s4243_s17, %s4243_s17 }
 0xf3d   :  { %p4250_p10 = por %p4249_p9, %p4248_p8 }
 0xf3f   :  { %p4251_p11 = pnand %p4250_p10, %p4244_p7 }
 0xfa2   :  { %v3570_v58 = vpop.permute.xlu0 %3569 }
 0xfa3   :  { %4254 = shalt.err (!%p4251_p11)
}
 0xfa4   :  { %3625 = dma.vmem_to_hbm [thread:$0]  %s3623_s10, 32, %s4991_s15, [#allocation16]   ;;  %v3575_v45 = vmul.f32 %v4099_v57, %v3570_v58 }
 0xfa5   :  { %s4263_s14 = scalar_lea.vmem %s3633_s0, 32  ;;  %p4268_p13 = scmp.lt.s32.totalorder %s3633_s0, %s3633_s0 }
 0xfa6   :  { %p4264_p12 = scmp.ne.s32.totalorder %s3633_s0, %s4263_s14  ;;  %p4269_p0 = scmp.lt.s32.totalorder %s4263_s14, %s4263_s14 }
 0xfa8   :  { %p4270_p1 = por %p4269_p0, %p4268_p13 }
 0xfaa   :  { %p4271_p2 = pnand %p4270_p1, %p4264_p12 }
 0xfac   :  { %4274 = shalt.err (!%p4271_p2)
}
 0xfad   :  { %3635 = dma.vmem_to_hbm [thread:$0]  %s3633_s0, 32, %s4992_s16, [#allocation19]   ;;  %3582 = vrot.lane.b32.xlu0 %v3575_v45, %s4324_s1  ;;  %v4101_v56 = vpop.eup %4100  ;;  %v3572_v59 = vpop.permute.xlu0 %3571 }
 0xfae   :  { %v3576_v60 = vmul.f32 %v4101_v56, %v3572_v59  ;;  %s4346_s15 = smov [#allocation14]  }
 0xfaf   :  { %s3597_s3 = sshll.u32 %s4346_s15, 4  ;;  %s3598_s3 = int_to_ptr.vmem [resolvable:$true] %s3597_s3 }
 0xfb0   :  { %s4283_s16 = scalar_lea.vmem %s3598_s3, 256  ;;  %p4288_p4 = scmp.lt.s32.totalorder %s3598_s3, %s3598_s3 }
 0xfb1   :  { %3584 = vrot.lane.b32.xlu0 %v3576_v60, %s4324_s1  ;;  %p4284_p3 = scmp.ne.s32.totalorder %s3598_s3, %s4283_s16  ;;  %p4289_p5 = scmp.lt.s32.totalorder %s4283_s16, %s4283_s16 }
 0xfb3   :  { %p4290_p6 = por %p4289_p5, %p4288_p4 }
 0xfb5   :  { %p4291_p7 = pnand %p4290_p6, %p4284_p3 }
0x101f   :  { %v3583_v1 = vpop.permute.xlu0 %3582 }
0x1020   :  { %v3588_v61 = vadd.f32 %v3583_v1, %v4885_v30 }
0x1022   :  { %3590 = vst.msk [vmem:[#allocation14] sm:$0xff] %vm131_vm0, %v3588_v61 }
0x1023   :  { %v3585_v3 = vpop.permute.xlu0 %3584 }
0x1024   :  { %v3589_v28 = vadd.f32 %v3585_v3, %v4890_v37 }
0x1026   :  { %3591 = vst.msk [vmem:[#allocation14 + $0x8] sm:$0xff] %vm131_vm0, %v3589_v28 }
0x1027   :  { %4294 = shalt.err (!%p4291_p7)
}
0x1028   :  { %3603 = dma.vmem_to_hbm [thread:$0]  %s3598_s3, 256, %s4989_s13, [#allocation5], %s4318_s24, %s4318_s24, %s4319_s25  }
0x1029   :  { %4311 = dma.done.wait [#allocation5], 256  }
0x102a   :  { %4312 = vsyncadd [#allocation5], 4294967040 }
0x102b   :  { %4313 = dma.done.wait [#allocation16], 1056  }
0x102c   :  { %4314 = vsyncadd [#allocation16], 4294966240 }
0x102d   :  { %4315 = dma.done.wait [#allocation19], 32  }
0x102e   :  { %4316 = vsyncadd [#allocation19], 4294967264 }
0x102f   :  { %3648 = vsyncpa [#allocation4], 1 }
0x1030   :  { %3649 = vsyncpa [#allocation7], 1 }
0x1031   :  { %3650 = vsyncpa [#allocation10], 1 }
0x1032   :  { %3651 = vsyncpa [#allocation13], 1 }
0x1033   :  { %3652 = vsyncpa [#allocation5], 1 }
0x1034   :  { %3653 = vsyncpa [#allocation16], 1 }
0x1035   :  { %3654 = vsyncpa [#allocation19], 1 }

</bundles_post_ra>
